<compile_context>
chip_gen: v5e
topology: v5e:2x2
jax: 0.10.0
libtpu: 0.0.40
codegen_flags: <defaults>
</compile_context>

<pallas_src>
import numpy as np
import jax
import jax.numpy as jnp
from jax.experimental import pallas as pl
from jax.experimental.pallas import tpu as pltpu


def afm_kernel(emb_ref, lin_ref, wbig_ref, wsel_ref, cpack_ref, out_ref, inner_ref):
    NF, D, _ = emb_ref.shape
    R, H = wsel_ref.shape            # R = #pairs padded to sublane multiple, H = P*A
    HR = wbig_ref.shape[0]           # H + R

    # 1) pairwise field products, sublane-stacked into the VMEM scratch [P*D, tb].
    #    Per-pair ref reads keep the live vreg set small at large tb.
    p = 0
    for i in range(NF - 1):
        for j in range(i + 1, NF):
            inner_ref[p * D:(p + 1) * D, :] = emb_ref[i] * emb_ref[j]
            p += 1

    # 2) one block-diagonal matmul: rows 0:H are the attention-MLP hidden
    #    activations for every pair, rows H:HR are the per-pair fc projections
    #    r_p = <fc_w, inner_p> (fc is linear, so it folds through the softmax sum).
    outb = jnp.dot(wbig_ref[...], inner_ref[...],
                   preferred_element_type=jnp.float32)
    outb = outb + cpack_ref[0:HR, :]                 # attention bias (0 on r rows)
    h = jnp.maximum(outb[0:H, :], 0.0)               # [H, tb] relu
    r = outb[H:HR, :]                                # [R, tb]

    # 3) pair logits packed along sublanes: [R, tb]. Projection bias cancels in
    #    the softmax; padded pair rows are masked to -1e30.
    logits = jnp.dot(wsel_ref[...], h, preferred_element_type=jnp.float32)
    logits = logits + cpack_ref[HR:HR + R, :]
    m = jnp.max(logits, axis=0, keepdims=True)       # [1, tb]
    e = jnp.exp(logits - m)                          # [R, tb]
    denom = jnp.sum(e, axis=0, keepdims=True)        # [1, tb]
    num = jnp.sum(e * r, axis=0, keepdims=True)      # [1, tb]
    # TODO(synk): F.dropout on the attention scores / attention output is
    # training-mode stochastic behaviour; treated as identity (eval mode).
    fc_out = num * pl.reciprocal(denom, approx=True)

    # 4) sigmoid(linear + fc); linear term, global bias and fc bias are
    #    pre-folded into lin_ref by the wrapper.
    out_ref[...] = jax.nn.sigmoid(lin_ref[...] + fc_out)


def afm_forward(item_feature, user_embedding, item_embedding, params, *, tb=2048):
    offsets = params["offsets"]              # [F] int32
    lin_table = params["lin_table"]          # [V, 1]
    emb_table = params["emb_table"]          # [V, D]
    attn_w = params["attn_w"]                # [A, D]   (torch Linear layout)
    attn_b = params["attn_b"]                # [A]
    proj_w = params["proj_w"]                # [1, A]
    fc_w = params["fc_w"]                    # [1, D]
    fc_b = params["fc_b"]                    # [1]
    bias = params["bias"]                    # [1]

    B, F = item_feature.shape
    D = emb_table.shape[1]
    A = attn_w.shape[0]
    NF = F + 2
    P = NF * (NF - 1) // 2
    assert A % 8 == 0, "attention_dim must be a multiple of 8 (sublane slicing)"

    # Batch tile: large (amortizes per-grid-step overhead / DMA), multiple of
    # 128, but keep >= 2 grid steps when the batch allows (v7x has 2 TCs).
    half = -(-B // 2)
    tb = max(128, min(tb, ((half + 127) // 128) * 128))
    B_pad = ((B + tb - 1) // tb) * tb

    # ---- plain-JAX glue: pad indices (cheap) instead of tensors, and gather
    # straight into the kernel's [NF, D, B] lane-major layout from the
    # pre-transposed table. The jnp.stack below is the only full-tensor
    # materialization (no [B,NF,D]->[NF,D,B] transpose, no big pad).
    idx = item_feature + offsets[None, :]                      # [B, F]
    idx = jnp.pad(idx, ((0, B_pad - B), (0, 0)))               # pad rows -> index 0
    lin_row = (jnp.sum(lin_table[idx, 0], axis=1)
               + bias[0] + fc_b[0])[None, :]                   # [1, B_pad]

    emb_table_t = emb_table.T                                  # [D, V]
    ue = jnp.pad(user_embedding, ((0, B_pad - B), (0, 0)))
    ie = jnp.pad(item_embedding, ((0, B_pad - B), (0, 0)))
    emb_t = jnp.stack([emb_table_t[:, idx[:, f]] for f in range(F)]
                      + [ie.T, ue.T], axis=0)                  # [NF, D, B_pad]

    # ---- fold the per-pair weights into block-diagonal constants (parameters
    # only; would be precomputed once per model in production).
    H = P * A                       # stacked attention-hidden rows
    K = P * D                       # stacked pairwise-product rows
    R = ((P + 7) // 8) * 8          # pair rows padded to a sublane multiple
    HR = H + R
    attn_w_np = np.asarray(attn_w, np.float32)
    attn_b_np = np.asarray(attn_b, np.float32)
    proj_w_np = np.asarray(proj_w, np.float32)
    fc_w_np = np.asarray(fc_w, np.float32)
    wbig = np.zeros((HR, K), np.float32)        # block-diag(attn_w) + fc_w rows
    wsel = np.zeros((R, H), np.float32)         # block-diag(proj_w) rows
    cpack = np.zeros((HR + R, 1), np.float32)   # [attention bias | softmax mask]
    for p in range(P):
        wbig[p * A:(p + 1) * A, p * D:(p + 1) * D] = attn_w_np
        wbig[H + p, p * D:(p + 1) * D] = fc_w_np[0]
        wsel[p, p * A:(p + 1) * A] = proj_w_np[0]
        cpack[p * A:(p + 1) * A, 0] = attn_b_np
    cpack[HR + P:HR + R, 0] = -1e30             # mask padded pair rows out of softmax

    out = pl.pallas_call(
        afm_kernel,
        out_shape=jax.ShapeDtypeStruct((1, B_pad), jnp.float32),
        grid=(B_pad // tb,),
        in_specs=[
            pl.BlockSpec((NF, D, tb), lambda i: (0, 0, i)),    # embeddings
            pl.BlockSpec((1, tb), lambda i: (0, i)),           # linear + biases
            pl.BlockSpec((HR, K), lambda i: (0, 0)),           # block-diag attn/fc W
            pl.BlockSpec((R, H), lambda i: (0, 0)),            # block-diag proj W
            pl.BlockSpec((HR + R, 1), lambda i: (0, 0)),       # bias | mask column
        ],
        out_specs=pl.BlockSpec((1, tb), lambda i: (0, i)),
        scratch_shapes=[pltpu.VMEM((K, tb), jnp.float32)],     # stacked pair products
        compiler_params=pltpu.CompilerParams(
            dimension_semantics=("parallel",),
            vmem_limit_bytes=32 * 1024 * 1024),
    )(emb_t, lin_row, jnp.asarray(wbig), jnp.asarray(wsel), jnp.asarray(cpack))
    return out[0, :B]                                          # [B]


def afm_reference(item_feature, user_embedding, item_embedding, params):
    """Pure-JAX reference mirroring the PyTorch forward (dropout = identity)."""
    idx = item_feature + params["offsets"][None, :]
    linear_part = jnp.sum(params["lin_table"][idx], axis=1) + params["bias"]   # [B, 1]
    tmp = params["emb_table"][idx]
    tmp = jnp.concatenate(
        [tmp, item_embedding[:, None, :], user_embedding[:, None, :]], axis=1)
    nf = tmp.shape[1]
    rows = [i for i in range(nf - 1) for j in range(i + 1, nf)]
    cols = [j for i in range(nf - 1) for j in range(i + 1, nf)]
    inner = tmp[:, rows] * tmp[:, cols]                                        # [B, P, D]
    h = jax.nn.relu(inner @ params["attn_w"].T + params["attn_b"])             # [B, P, A]
    logits = h @ params["proj_w"].T + params["proj_b"]                         # [B, P, 1]
    scores = jax.nn.softmax(logits, axis=1)
    attn_out = jnp.sum(scores * inner, axis=1)                                 # [B, D]
    fc_out = attn_out @ params["fc_w"].T + params["fc_b"]                      # [B, 1]
    return jax.nn.sigmoid((linear_part + fc_out)[:, 0])


def make_params(fields, embedding_dim, attention_dim, key):
    vocab = int(sum(fields)) + 1
    k = jax.random.split(key, 8)
    xav = np.sqrt(6.0 / (vocab + embedding_dim))
    return {
        "offsets": jnp.asarray(
            np.array((0, *np.cumsum(fields)[:-1]), dtype=np.int32)),
        "lin_table": jax.random.normal(k[0], (vocab, 1), jnp.float32) * 0.1,
        "emb_table": jax.random.uniform(k[1], (vocab, embedding_dim),
                                        jnp.float32, -xav, xav),
        "attn_w": jax.random.normal(k[2], (attention_dim, embedding_dim),
                                    jnp.float32) * 0.1,
        "attn_b": jax.random.normal(k[3], (attention_dim,), jnp.float32) * 0.1,
        "proj_w": jax.random.normal(k[4], (1, attention_dim), jnp.float32) * 0.1,
        "proj_b": jax.random.normal(k[5], (1,), jnp.float32) * 0.1,
        "fc_w": jax.random.normal(k[6], (1, embedding_dim), jnp.float32) * 0.1,
        "fc_b": jax.random.normal(k[7], (1,), jnp.float32) * 0.1,
        "bias": jnp.zeros((1,), jnp.float32),
    }


if __name__ == "__main__":
    fields = (5, 7, 3, 4)      # 4 categorical fields -> NF = 6 with user/item
    embedding_dim = 16
    attention_dim = 16
    B = 500                    # not a multiple of 128 -> exercises pad-and-slice

    key = jax.random.PRNGKey(0)
    kp, kf, ku, ki = jax.random.split(key, 4)
    params = make_params(fields, embedding_dim, attention_dim, kp)

    # item_feature: per-field category indices in [0, fields[f])
    raw = jax.random.randint(kf, (B, len(fields)), 0, 10_000, dtype=jnp.int32)
    item_feature = raw % jnp.asarray(np.array(fields, dtype=np.int32))[None, :]
    user_embedding = jax.random.normal(ku, (B, embedding_dim), jnp.float32)
    item_embedding = jax.random.normal(ki, (B, embedding_dim), jnp.float32)

    out = afm_forward(item_feature, user_embedding, item_embedding, params)
    out = jax.block_until_ready(out)

    ref = afm_reference(item_feature, user_embedding, item_embedding, params)
    assert out.shape == (B,)
    err = np.max(np.abs(np.asarray(out) - np.asarray(ref)))
    # pl.reciprocal(approx=True) in the softmax denominator gives ~1e-4-level
    # output error here; switch to approx=False if tighter parity is required.
    assert np.allclose(np.asarray(out), np.asarray(ref), atol=1e-3, rtol=1e-3), err

    print("KERNEL_OK")
</pallas_src>

<mosaic_0001>
module attributes {stable_mosaic.version = 11 : i64} {
  func.func @afm_kernel(%arg0: i32, %arg1: memref<6x16x256xf32, #tpu.memory_space<vmem>>, %arg2: memref<1x256xf32, #tpu.memory_space<vmem>>, %arg3: memref<256x240xf32, #tpu.memory_space<vmem>>, %arg4: memref<16x240xf32, #tpu.memory_space<vmem>>, %arg5: memref<272x1xf32, #tpu.memory_space<vmem>>, %arg6: memref<1x256xf32, #tpu.memory_space<vmem>>, %arg7: memref<240x256xf32, #tpu.memory_space<vmem>>) attributes {dimension_semantics = [#tpu.dimension_semantics<parallel>], iteration_bounds = array<i64: 2>, scalar_prefetch = 0 : i64, scratch_operands = 1 : i64, tpu.core_type = #tpu.core_type<tc>, window_params = [{transform_indices = @transform_0, window_bounds = array<i64: 6, 16, 256>}, {transform_indices = @transform_1, window_bounds = array<i64: 1, 256>}, {pipeline_mode = #tpu.pipeline_mode<synchronous>, transform_indices = @transform_2, window_bounds = array<i64: 256, 240>}, {pipeline_mode = #tpu.pipeline_mode<synchronous>, transform_indices = @transform_3, window_bounds = array<i64: 16, 240>}, {pipeline_mode = #tpu.pipeline_mode<synchronous>, transform_indices = @transform_4, window_bounds = array<i64: 272, 1>}, {transform_indices = @transform_5, window_bounds = array<i64: 1, 256>}]} {
    %c0 = arith.constant 0 : index
    %c0_0 = arith.constant 0 : index
    %c0_1 = arith.constant 0 : index
    %0 = vector.load %arg1[%c0, %c0_0, %c0_1] : memref<6x16x256xf32, #tpu.memory_space<vmem>>, vector<1x16x256xf32>
    %1 = vector.shape_cast %0 : vector<1x16x256xf32> to vector<16x256xf32>
    %c1 = arith.constant 1 : index
    %c0_2 = arith.constant 0 : index
    %c0_3 = arith.constant 0 : index
    %2 = vector.load %arg1[%c1, %c0_2, %c0_3] : memref<6x16x256xf32, #tpu.memory_space<vmem>>, vector<1x16x256xf32>
    %3 = vector.shape_cast %2 : vector<1x16x256xf32> to vector<16x256xf32>
    %4 = arith.mulf %1, %3 : vector<16x256xf32>
    %c0_4 = arith.constant 0 : index
    %c0_5 = arith.constant 0 : index
    %5 = vector.load %arg7[%c0_4, %c0_5] : memref<240x256xf32, #tpu.memory_space<vmem>>, vector<16x256xf32>
    tpu.vector_store %arg7[%c0_4, %c0_5], %4 {strides = array<i32>} : memref<240x256xf32, #tpu.memory_space<vmem>>, vector<16x256xf32>,
    %c0_6 = arith.constant 0 : index
    %c0_7 = arith.constant 0 : index
    %c0_8 = arith.constant 0 : index
    %6 = vector.load %arg1[%c0_6, %c0_7, %c0_8] : memref<6x16x256xf32, #tpu.memory_space<vmem>>, vector<1x16x256xf32>
    %7 = vector.shape_cast %6 : vector<1x16x256xf32> to vector<16x256xf32>
    %c2 = arith.constant 2 : index
    %c0_9 = arith.constant 0 : index
    %c0_10 = arith.constant 0 : index
    %8 = vector.load %arg1[%c2, %c0_9, %c0_10] : memref<6x16x256xf32, #tpu.memory_space<vmem>>, vector<1x16x256xf32>
    %9 = vector.shape_cast %8 : vector<1x16x256xf32> to vector<16x256xf32>
    %10 = arith.mulf %7, %9 : vector<16x256xf32>
    %c16 = arith.constant 16 : index
    %c0_11 = arith.constant 0 : index
    %11 = vector.load %arg7[%c16, %c0_11] : memref<240x256xf32, #tpu.memory_space<vmem>>, vector<16x256xf32>
    tpu.vector_store %arg7[%c16, %c0_11], %10 {strides = array<i32>} : memref<240x256xf32, #tpu.memory_space<vmem>>, vector<16x256xf32>,
    %c0_12 = arith.constant 0 : index
    %c0_13 = arith.constant 0 : index
    %c0_14 = arith.constant 0 : index
    %12 = vector.load %arg1[%c0_12, %c0_13, %c0_14] : memref<6x16x256xf32, #tpu.memory_space<vmem>>, vector<1x16x256xf32>
    %13 = vector.shape_cast %12 : vector<1x16x256xf32> to vector<16x256xf32>
    %c3 = arith.constant 3 : index
    %c0_15 = arith.constant 0 : index
    %c0_16 = arith.constant 0 : index
    %14 = vector.load %arg1[%c3, %c0_15, %c0_16] : memref<6x16x256xf32, #tpu.memory_space<vmem>>, vector<1x16x256xf32>
    %15 = vector.shape_cast %14 : vector<1x16x256xf32> to vector<16x256xf32>
    %16 = arith.mulf %13, %15 : vector<16x256xf32>
    %c32 = arith.constant 32 : index
    %c0_17 = arith.constant 0 : index
    %17 = vector.load %arg7[%c32, %c0_17] : memref<240x256xf32, #tpu.memory_space<vmem>>, vector<16x256xf32>
    tpu.vector_store %arg7[%c32, %c0_17], %16 {strides = array<i32>} : memref<240x256xf32, #tpu.memory_space<vmem>>, vector<16x256xf32>,
    %c0_18 = arith.constant 0 : index
    %c0_19 = arith.constant 0 : index
    %c0_20 = arith.constant 0 : index
    %18 = vector.load %arg1[%c0_18, %c0_19, %c0_20] : memref<6x16x256xf32, #tpu.memory_space<vmem>>, vector<1x16x256xf32>
    %19 = vector.shape_cast %18 : vector<1x16x256xf32> to vector<16x256xf32>
    %c4 = arith.constant 4 : index
    %c0_21 = arith.constant 0 : index
    %c0_22 = arith.constant 0 : index
    %20 = vector.load %arg1[%c4, %c0_21, %c0_22] : memref<6x16x256xf32, #tpu.memory_space<vmem>>, vector<1x16x256xf32>
    %21 = vector.shape_cast %20 : vector<1x16x256xf32> to vector<16x256xf32>
    %22 = arith.mulf %19, %21 : vector<16x256xf32>
    %c48 = arith.constant 48 : index
    %c0_23 = arith.constant 0 : index
    %23 = vector.load %arg7[%c48, %c0_23] : memref<240x256xf32, #tpu.memory_space<vmem>>, vector<16x256xf32>
    tpu.vector_store %arg7[%c48, %c0_23], %22 {strides = array<i32>} : memref<240x256xf32, #tpu.memory_space<vmem>>, vector<16x256xf32>,
    %c0_24 = arith.constant 0 : index
    %c0_25 = arith.constant 0 : index
    %c0_26 = arith.constant 0 : index
    %24 = vector.load %arg1[%c0_24, %c0_25, %c0_26] : memref<6x16x256xf32, #tpu.memory_space<vmem>>, vector<1x16x256xf32>
    %25 = vector.shape_cast %24 : vector<1x16x256xf32> to vector<16x256xf32>
    %c5 = arith.constant 5 : index
    %c0_27 = arith.constant 0 : index
    %c0_28 = arith.constant 0 : index
    %26 = vector.load %arg1[%c5, %c0_27, %c0_28] : memref<6x16x256xf32, #tpu.memory_space<vmem>>, vector<1x16x256xf32>
    %27 = vector.shape_cast %26 : vector<1x16x256xf32> to vector<16x256xf32>
    %28 = arith.mulf %25, %27 : vector<16x256xf32>
    %c64 = arith.constant 64 : index
    %c0_29 = arith.constant 0 : index
    %29 = vector.load %arg7[%c64, %c0_29] : memref<240x256xf32, #tpu.memory_space<vmem>>, vector<16x256xf32>
    tpu.vector_store %arg7[%c64, %c0_29], %28 {strides = array<i32>} : memref<240x256xf32, #tpu.memory_space<vmem>>, vector<16x256xf32>,
    %c1_30 = arith.constant 1 : index
    %c0_31 = arith.constant 0 : index
    %c0_32 = arith.constant 0 : index
    %30 = vector.load %arg1[%c1_30, %c0_31, %c0_32] : memref<6x16x256xf32, #tpu.memory_space<vmem>>, vector<1x16x256xf32>
    %31 = vector.shape_cast %30 : vector<1x16x256xf32> to vector<16x256xf32>
    %c2_33 = arith.constant 2 : index
    %c0_34 = arith.constant 0 : index
    %c0_35 = arith.constant 0 : index
    %32 = vector.load %arg1[%c2_33, %c0_34, %c0_35] : memref<6x16x256xf32, #tpu.memory_space<vmem>>, vector<1x16x256xf32>
    %33 = vector.shape_cast %32 : vector<1x16x256xf32> to vector<16x256xf32>
    %34 = arith.mulf %31, %33 : vector<16x256xf32>
    %c80 = arith.constant 80 : index
    %c0_36 = arith.constant 0 : index
    %35 = vector.load %arg7[%c80, %c0_36] : memref<240x256xf32, #tpu.memory_space<vmem>>, vector<16x256xf32>
    tpu.vector_store %arg7[%c80, %c0_36], %34 {strides = array<i32>} : memref<240x256xf32, #tpu.memory_space<vmem>>, vector<16x256xf32>,
    %c1_37 = arith.constant 1 : index
    %c0_38 = arith.constant 0 : index
    %c0_39 = arith.constant 0 : index
    %36 = vector.load %arg1[%c1_37, %c0_38, %c0_39] : memref<6x16x256xf32, #tpu.memory_space<vmem>>, vector<1x16x256xf32>
    %37 = vector.shape_cast %36 : vector<1x16x256xf32> to vector<16x256xf32>
    %c3_40 = arith.constant 3 : index
    %c0_41 = arith.constant 0 : index
    %c0_42 = arith.constant 0 : index
    %38 = vector.load %arg1[%c3_40, %c0_41, %c0_42] : memref<6x16x256xf32, #tpu.memory_space<vmem>>, vector<1x16x256xf32>
    %39 = vector.shape_cast %38 : vector<1x16x256xf32> to vector<16x256xf32>
    %40 = arith.mulf %37, %39 : vector<16x256xf32>
    %c96 = arith.constant 96 : index
    %c0_43 = arith.constant 0 : index
    %41 = vector.load %arg7[%c96, %c0_43] : memref<240x256xf32, #tpu.memory_space<vmem>>, vector<16x256xf32>
    tpu.vector_store %arg7[%c96, %c0_43], %40 {strides = array<i32>} : memref<240x256xf32, #tpu.memory_space<vmem>>, vector<16x256xf32>,
    %c1_44 = arith.constant 1 : index
    %c0_45 = arith.constant 0 : index
    %c0_46 = arith.constant 0 : index
    %42 = vector.load %arg1[%c1_44, %c0_45, %c0_46] : memref<6x16x256xf32, #tpu.memory_space<vmem>>, vector<1x16x256xf32>
    %43 = vector.shape_cast %42 : vector<1x16x256xf32> to vector<16x256xf32>
    %c4_47 = arith.constant 4 : index
    %c0_48 = arith.constant 0 : index
    %c0_49 = arith.constant 0 : index
    %44 = vector.load %arg1[%c4_47, %c0_48, %c0_49] : memref<6x16x256xf32, #tpu.memory_space<vmem>>, vector<1x16x256xf32>
    %45 = vector.shape_cast %44 : vector<1x16x256xf32> to vector<16x256xf32>
    %46 = arith.mulf %43, %45 : vector<16x256xf32>
    %c112 = arith.constant 112 : index
    %c0_50 = arith.constant 0 : index
    %47 = vector.load %arg7[%c112, %c0_50] : memref<240x256xf32, #tpu.memory_space<vmem>>, vector<16x256xf32>
    tpu.vector_store %arg7[%c112, %c0_50], %46 {strides = array<i32>} : memref<240x256xf32, #tpu.memory_space<vmem>>, vector<16x256xf32>,
    %c1_51 = arith.constant 1 : index
    %c0_52 = arith.constant 0 : index
    %c0_53 = arith.constant 0 : index
    %48 = vector.load %arg1[%c1_51, %c0_52, %c0_53] : memref<6x16x256xf32, #tpu.memory_space<vmem>>, vector<1x16x256xf32>
    %49 = vector.shape_cast %48 : vector<1x16x256xf32> to vector<16x256xf32>
    %c5_54 = arith.constant 5 : index
    %c0_55 = arith.constant 0 : index
    %c0_56 = arith.constant 0 : index
    %50 = vector.load %arg1[%c5_54, %c0_55, %c0_56] : memref<6x16x256xf32, #tpu.memory_space<vmem>>, vector<1x16x256xf32>
    %51 = vector.shape_cast %50 : vector<1x16x256xf32> to vector<16x256xf32>
    %52 = arith.mulf %49, %51 : vector<16x256xf32>
    %c128 = arith.constant 128 : index
    %c0_57 = arith.constant 0 : index
    %53 = vector.load %arg7[%c128, %c0_57] : memref<240x256xf32, #tpu.memory_space<vmem>>, vector<16x256xf32>
    tpu.vector_store %arg7[%c128, %c0_57], %52 {strides = array<i32>} : memref<240x256xf32, #tpu.memory_space<vmem>>, vector<16x256xf32>,
    %c2_58 = arith.constant 2 : index
    %c0_59 = arith.constant 0 : index
    %c0_60 = arith.constant 0 : index
    %54 = vector.load %arg1[%c2_58, %c0_59, %c0_60] : memref<6x16x256xf32, #tpu.memory_space<vmem>>, vector<1x16x256xf32>
    %55 = vector.shape_cast %54 : vector<1x16x256xf32> to vector<16x256xf32>
    %c3_61 = arith.constant 3 : index
    %c0_62 = arith.constant 0 : index
    %c0_63 = arith.constant 0 : index
    %56 = vector.load %arg1[%c3_61, %c0_62, %c0_63] : memref<6x16x256xf32, #tpu.memory_space<vmem>>, vector<1x16x256xf32>
    %57 = vector.shape_cast %56 : vector<1x16x256xf32> to vector<16x256xf32>
    %58 = arith.mulf %55, %57 : vector<16x256xf32>
    %c144 = arith.constant 144 : index
    %c0_64 = arith.constant 0 : index
    %59 = vector.load %arg7[%c144, %c0_64] : memref<240x256xf32, #tpu.memory_space<vmem>>, vector<16x256xf32>
    tpu.vector_store %arg7[%c144, %c0_64], %58 {strides = array<i32>} : memref<240x256xf32, #tpu.memory_space<vmem>>, vector<16x256xf32>,
    %c2_65 = arith.constant 2 : index
    %c0_66 = arith.constant 0 : index
    %c0_67 = arith.constant 0 : index
    %60 = vector.load %arg1[%c2_65, %c0_66, %c0_67] : memref<6x16x256xf32, #tpu.memory_space<vmem>>, vector<1x16x256xf32>
    %61 = vector.shape_cast %60 : vector<1x16x256xf32> to vector<16x256xf32>
    %c4_68 = arith.constant 4 : index
    %c0_69 = arith.constant 0 : index
    %c0_70 = arith.constant 0 : index
    %62 = vector.load %arg1[%c4_68, %c0_69, %c0_70] : memref<6x16x256xf32, #tpu.memory_space<vmem>>, vector<1x16x256xf32>
    %63 = vector.shape_cast %62 : vector<1x16x256xf32> to vector<16x256xf32>
    %64 = arith.mulf %61, %63 : vector<16x256xf32>
    %c160 = arith.constant 160 : index
    %c0_71 = arith.constant 0 : index
    %65 = vector.load %arg7[%c160, %c0_71] : memref<240x256xf32, #tpu.memory_space<vmem>>, vector<16x256xf32>
    tpu.vector_store %arg7[%c160, %c0_71], %64 {strides = array<i32>} : memref<240x256xf32, #tpu.memory_space<vmem>>, vector<16x256xf32>,
    %c2_72 = arith.constant 2 : index
    %c0_73 = arith.constant 0 : index
    %c0_74 = arith.constant 0 : index
    %66 = vector.load %arg1[%c2_72, %c0_73, %c0_74] : memref<6x16x256xf32, #tpu.memory_space<vmem>>, vector<1x16x256xf32>
    %67 = vector.shape_cast %66 : vector<1x16x256xf32> to vector<16x256xf32>
    %c5_75 = arith.constant 5 : index
    %c0_76 = arith.constant 0 : index
    %c0_77 = arith.constant 0 : index
    %68 = vector.load %arg1[%c5_75, %c0_76, %c0_77] : memref<6x16x256xf32, #tpu.memory_space<vmem>>, vector<1x16x256xf32>
    %69 = vector.shape_cast %68 : vector<1x16x256xf32> to vector<16x256xf32>
    %70 = arith.mulf %67, %69 : vector<16x256xf32>
    %c176 = arith.constant 176 : index
    %c0_78 = arith.constant 0 : index
    %71 = vector.load %arg7[%c176, %c0_78] : memref<240x256xf32, #tpu.memory_space<vmem>>, vector<16x256xf32>
    tpu.vector_store %arg7[%c176, %c0_78], %70 {strides = array<i32>} : memref<240x256xf32, #tpu.memory_space<vmem>>, vector<16x256xf32>,
    %c3_79 = arith.constant 3 : index
    %c0_80 = arith.constant 0 : index
    %c0_81 = arith.constant 0 : index
    %72 = vector.load %arg1[%c3_79, %c0_80, %c0_81] : memref<6x16x256xf32, #tpu.memory_space<vmem>>, vector<1x16x256xf32>
    %73 = vector.shape_cast %72 : vector<1x16x256xf32> to vector<16x256xf32>
    %c4_82 = arith.constant 4 : index
    %c0_83 = arith.constant 0 : index
    %c0_84 = arith.constant 0 : index
    %74 = vector.load %arg1[%c4_82, %c0_83, %c0_84] : memref<6x16x256xf32, #tpu.memory_space<vmem>>, vector<1x16x256xf32>
    %75 = vector.shape_cast %74 : vector<1x16x256xf32> to vector<16x256xf32>
    %76 = arith.mulf %73, %75 : vector<16x256xf32>
    %c192 = arith.constant 192 : index
    %c0_85 = arith.constant 0 : index
    %77 = vector.load %arg7[%c192, %c0_85] : memref<240x256xf32, #tpu.memory_space<vmem>>, vector<16x256xf32>
    tpu.vector_store %arg7[%c192, %c0_85], %76 {strides = array<i32>} : memref<240x256xf32, #tpu.memory_space<vmem>>, vector<16x256xf32>,
    %c3_86 = arith.constant 3 : index
    %c0_87 = arith.constant 0 : index
    %c0_88 = arith.constant 0 : index
    %78 = vector.load %arg1[%c3_86, %c0_87, %c0_88] : memref<6x16x256xf32, #tpu.memory_space<vmem>>, vector<1x16x256xf32>
    %79 = vector.shape_cast %78 : vector<1x16x256xf32> to vector<16x256xf32>
    %c5_89 = arith.constant 5 : index
    %c0_90 = arith.constant 0 : index
    %c0_91 = arith.constant 0 : index
    %80 = vector.load %arg1[%c5_89, %c0_90, %c0_91] : memref<6x16x256xf32, #tpu.memory_space<vmem>>, vector<1x16x256xf32>
    %81 = vector.shape_cast %80 : vector<1x16x256xf32> to vector<16x256xf32>
    %82 = arith.mulf %79, %81 : vector<16x256xf32>
    %c208 = arith.constant 208 : index
    %c0_92 = arith.constant 0 : index
    %83 = vector.load %arg7[%c208, %c0_92] : memref<240x256xf32, #tpu.memory_space<vmem>>, vector<16x256xf32>
    tpu.vector_store %arg7[%c208, %c0_92], %82 {strides = array<i32>} : memref<240x256xf32, #tpu.memory_space<vmem>>, vector<16x256xf32>,
    %c4_93 = arith.constant 4 : index
    %c0_94 = arith.constant 0 : index
    %c0_95 = arith.constant 0 : index
    %84 = vector.load %arg1[%c4_93, %c0_94, %c0_95] : memref<6x16x256xf32, #tpu.memory_space<vmem>>, vector<1x16x256xf32>
    %85 = vector.shape_cast %84 : vector<1x16x256xf32> to vector<16x256xf32>
    %c5_96 = arith.constant 5 : index
    %c0_97 = arith.constant 0 : index
    %c0_98 = arith.constant 0 : index
    %86 = vector.load %arg1[%c5_96, %c0_97, %c0_98] : memref<6x16x256xf32, #tpu.memory_space<vmem>>, vector<1x16x256xf32>
    %87 = vector.shape_cast %86 : vector<1x16x256xf32> to vector<16x256xf32>
    %88 = arith.mulf %85, %87 : vector<16x256xf32>
    %c224 = arith.constant 224 : index
    %c0_99 = arith.constant 0 : index
    %89 = vector.load %arg7[%c224, %c0_99] : memref<240x256xf32, #tpu.memory_space<vmem>>, vector<16x256xf32>
    tpu.vector_store %arg7[%c224, %c0_99], %88 {strides = array<i32>} : memref<240x256xf32, #tpu.memory_space<vmem>>, vector<16x256xf32>,
    %c0_100 = arith.constant 0 : index
    %c0_101 = arith.constant 0 : index
    %90 = vector.load %arg3[%c0_100, %c0_101] : memref<256x240xf32, #tpu.memory_space<vmem>>, vector<256x240xf32>
    %c0_102 = arith.constant 0 : index
    %c0_103 = arith.constant 0 : index
    %91 = vector.load %arg7[%c0_102, %c0_103] : memref<240x256xf32, #tpu.memory_space<vmem>>, vector<240x256xf32>
    %cst = arith.constant dense<0.000000e+00> : vector<256x256xf32>
    %92 = tpu.matmul %90, %91, %cst {dimension_numbers = #tpu.dot_dimension_numbers<[1], [0], [0], [1], [0, 0, 1, 1], [], []>} : vector<256x240xf32>, vector<240x256xf32>, vector<256x256xf32> -> vector<256x256xf32>
    %c0_104 = arith.constant 0 : index
    %c0_105 = arith.constant 0 : index
    %93 = vector.load %arg5[%c0_104, %c0_105] : memref<272x1xf32, #tpu.memory_space<vmem>>, vector<256x1xf32>
    %94 = vector.broadcast %93 : vector<256x1xf32> to vector<256x256xf32>
    %95 = arith.addf %92, %94 : vector<256x256xf32>
    %96 = vector.extract_strided_slice %95 {offsets = [0, 0], sizes = [240, 256], strides = [1, 1]} : vector<256x256xf32> to vector<240x256xf32>
    %cst_106 = arith.constant 0.000000e+00 : f32
    %97 = vector.broadcast %cst_106 : f32 to vector<240x256xf32>
    %98 = arith.maximumf %96, %97 : vector<240x256xf32>
    %99 = vector.extract_strided_slice %95 {offsets = [240, 0], sizes = [16, 256], strides = [1, 1]} : vector<256x256xf32> to vector<16x256xf32>
    %c0_107 = arith.constant 0 : index
    %c0_108 = arith.constant 0 : index
    %100 = vector.load %arg4[%c0_107, %c0_108] : memref<16x240xf32, #tpu.memory_space<vmem>>, vector<16x240xf32>
    %cst_109 = arith.constant dense<0.000000e+00> : vector<16x256xf32>
    %101 = tpu.matmul %100, %98, %cst_109 {dimension_numbers = #tpu.dot_dimension_numbers<[1], [0], [0], [1], [0, 0, 1, 1], [], []>} : vector<16x240xf32>, vector<240x256xf32>, vector<16x256xf32> -> vector<16x256xf32>
    %c256 = arith.constant 256 : index
    %c0_110 = arith.constant 0 : index
    %102 = vector.load %arg5[%c256, %c0_110] : memref<272x1xf32, #tpu.memory_space<vmem>>, vector<16x1xf32>
    %103 = vector.broadcast %102 : vector<16x1xf32> to vector<16x256xf32>
    %104 = arith.addf %101, %103 : vector<16x256xf32>
    %cst_111 = arith.constant dense<0xFF800000> : vector<256xf32>
    %105 = vector.multi_reduction <maximumf>, %104, %cst_111 [0] : vector<16x256xf32> to vector<256xf32>
    %106 = vector.shape_cast %105 : vector<256xf32> to vector<1x256xf32>
    %107 = vector.broadcast %106 : vector<1x256xf32> to vector<16x256xf32>
    %108 = arith.subf %104, %107 : vector<16x256xf32>
    %109 = math.exp %108 : vector<16x256xf32>
    %cst_112 = arith.constant dense<0.000000e+00> : vector<256xf32>
    %110 = vector.multi_reduction <add>, %109, %cst_112 [0] : vector<16x256xf32> to vector<256xf32>
    %111 = vector.shape_cast %110 : vector<256xf32> to vector<1x256xf32>
    %112 = arith.mulf %109, %99 : vector<16x256xf32>
    %cst_113 = arith.constant dense<0.000000e+00> : vector<256xf32>
    %113 = vector.multi_reduction <add>, %112, %cst_113 [0] : vector<16x256xf32> to vector<256xf32>
    %114 = vector.shape_cast %113 : vector<256xf32> to vector<1x256xf32>
    %115 = tpu.reciprocal %111 {approx = true} : vector<1x256xf32> -> vector<1x256xf32>
    %116 = arith.mulf %114, %115 : vector<1x256xf32>
    %c0_114 = arith.constant 0 : index
    %c0_115 = arith.constant 0 : index
    %117 = vector.load %arg2[%c0_114, %c0_115] : memref<1x256xf32, #tpu.memory_space<vmem>>, vector<1x256xf32>
    %118 = arith.addf %117, %116 : vector<1x256xf32>
    %119 = arith.negf %118 : vector<1x256xf32>
    %120 = math.exp %119 : vector<1x256xf32>
    %cst_116 = arith.constant 1.000000e+00 : f32
    %121 = vector.broadcast %cst_116 : f32 to vector<1x256xf32>
    %122 = arith.addf %121, %120 : vector<1x256xf32>
    %123 = arith.divf %121, %122 : vector<1x256xf32>
    %c0_117 = arith.constant 0 : index
    %c0_118 = arith.constant 0 : index
    %124 = vector.load %arg6[%c0_117, %c0_118] : memref<1x256xf32, #tpu.memory_space<vmem>>, vector<1x256xf32>
    tpu.vector_store %arg6[%c0_117, %c0_118], %123 {strides = array<i32>} : memref<1x256xf32, #tpu.memory_space<vmem>>, vector<1x256xf32>,
    return
  }
  func.func @transform_0(%arg0: i32) -> (i32, i32, i32) {
    %c0_i32 = arith.constant 0 : i32
    %c0_i32_0 = arith.constant 0 : i32
    %c0_i32_1 = arith.constant 0 : i32
    return %c0_i32, %c0_i32_0, %arg0 : i32, i32, i32
  }
  func.func @transform_1(%arg0: i32) -> (i32, i32) {
    %c0_i32 = arith.constant 0 : i32
    %c0_i32_0 = arith.constant 0 : i32
    return %c0_i32, %arg0 : i32, i32
  }
  func.func @transform_2(%arg0: i32) -> (i32, i32) {
    %c0_i32 = arith.constant 0 : i32
    %c0_i32_0 = arith.constant 0 : i32
    %c0_i32_1 = arith.constant 0 : i32
    return %c0_i32, %c0_i32_0 : i32, i32
  }
  func.func @transform_3(%arg0: i32) -> (i32, i32) {
    %c0_i32 = arith.constant 0 : i32
    %c0_i32_0 = arith.constant 0 : i32
    %c0_i32_1 = arith.constant 0 : i32
    return %c0_i32, %c0_i32_0 : i32, i32
  }
  func.func @transform_4(%arg0: i32) -> (i32, i32) {
    %c0_i32 = arith.constant 0 : i32
    %c0_i32_0 = arith.constant 0 : i32
    %c0_i32_1 = arith.constant 0 : i32
    return %c0_i32, %c0_i32_0 : i32, i32
  }
  func.func @transform_5(%arg0: i32) -> (i32, i32) {
    %c0_i32 = arith.constant 0 : i32
    %c0_i32_0 = arith.constant 0 : i32
    return %c0_i32, %arg0 : i32, i32
  }
}

</mosaic_0001>

<bundles_post_ra>
// kernel: tpu_custom_call.1
= control target key start
LH: loop header
LB: loop body
LE: loop exit
PB: predicated region body
PF: predicated region fallthrough
CT: control target
= control target key end

     0   :  { %10 = vsyncpa [#allocation5], 0  ;;  %s3108_s0 = inlined_call_operand.vmem [shape: f32[6,16,512], index: 0, kind: input, shape index: {}]   ;;  %s3109_s1 = inlined_call_operand.vmem [shape: f32[1,512], index: 1, kind: input, shape index: {}]   ;;  %s3110_s2 = inlined_call_operand.vmem [shape: f32[256,240], index: 2, kind: input, shape index: {}]   ;;  %s3111_s3 = inlined_call_operand.vmem [shape: f32[16,240], index: 3, kind: input, shape index: {}]   ;;  %s3112_s4 = inlined_call_operand.vmem [shape: f32[272,1], index: 4, kind: input, shape index: {}]   ;;  %s3113_s5 = inlined_call_operand.hbm [shape: f32[1,512], index: 5, kind: output, shape index: {}]  }
   0x1   :  { %12 = vsyncpa [#allocation5 + $0x1], 0  ;;  %s2116_s18 = smov 0   ;;  %s2118_s19 = smov 0  }
   0x2   :  { %s2120_s20 = smov 0   ;;  %s2122_s21 = smov 0  }
   0x3 LB: > { %s1777_s22 = sadd.s32 4294967295, %s2083_s21   ;;  %s1778_s23 = sadd.s32 4294967294, %s2083_s21   ;;  %s2083_s21 = sphi %s2122_s21, %s3181_s21   ;;  %s2079_s20 = sphi %s2120_s20, %s3180_s20   ;;  %s2075_s19 = sphi %s2118_s19, %s3179_s19   ;;  %s2071_s18 = sphi %s2116_s18, %s3178_s18  }
   0x4   : > { %s2139_s24 = sadd.s32 1, %s2083_s21   ;;  %s25_s25 = sadd.s32 1, %s2079_s20 }
   0x5   : > { %s22_s26 = ssub.s32 %s2083_s21, %s2139_s24  ;;  %p32_p0 = scmp.ne.s32.totalorder %s2079_s20, %s2075_s19 }
   0x6   : > { %p23_p1 = scmp.eq.s32.totalorder %s22_s26, 0  ;;  %p33_p2 = scmp.eq.s32.totalorder %s2083_s21, 0 }
   0x7   : > { %p151_p3 = scmp.eq.s32.totalorder %s1777_s22, 1  ;;  %p156_p4 = scmp.ne.s32.totalorder %s2075_s19, %s2071_s18 }
   0x8   : > { %s2152_s27 = scalar_select %p23_p1, %s2079_s20, %s25_s25  }
   0x9   : > { %p34_p5 = por %p33_p2, %p32_p0  ;;  %p2154_p6 = por %p151_p3, %p32_p0 }
   0xa   : > { %p157_p7 = scmp.eq.s32.totalorder %s1778_s23, 1  ;;  %p1780_p9 = scmp.ge.s32.totalorder %s2083_s21, 2 }
   0xc   : > { %p2158_p8 = por %p157_p7, %p156_p4  ;;  %182 = sbr.rel (%p1780_p9) target bundleno = 45 (0x2d), region = 28 }
  0x11   : > { %185 = sbr.rel (!%p34_p5) target bundleno = 45 (0x2d), region = 32  ;;  %s187_s30 = sand.u32 (%p34_p5), 1, %s2079_s20  }
  0x12   : > { %s1959_s6 = sshll.u32 (%p34_p5), %s2083_s21, 4  ;;  %s1960_s7 = smul.u32 (%p34_p5), 192, %s187_s30 }
  0x13   : > { %s2170_s10 = scalar_lea.vmem (%p34_p5), %s3108_s0, %s1959_s6 }
  0x14   : > { %v205_v0 = vld [vmem:[%s2170_s10] sm:$0xff] (%p34_p5)  ;;  %v207_v1 = vld [vmem:[%s2170_s10 + $0x8] sm:$0xff] (%p34_p5)  ;;  %s2175_s11 = scalar_lea.vmem (%p34_p5), [#allocation3], %s1960_s7 }
  0x15   : > { %v209_v2 = vld [vmem:[%s2170_s10 + $0x20] sm:$0xff] (%p34_p5)  ;;  %206 = vst [vmem:[%s2175_s11] sm:$0xff] (%p34_p5), %v205_v0  ;;  %v211_v3 = vld [vmem:[%s2170_s10 + $0x28] sm:$0xff] (%p34_p5) }
  0x16   : > { %208 = vst [vmem:[%s2175_s11 + $0x8] sm:$0xff] %v207_v1  ;;  %v213_v4 = vld [vmem:[%s2170_s10 + $0x40] sm:$0xff]  ;;  %v215_v5 = vld [vmem:[%s2170_s10 + $0x48] sm:$0xff] }
  0x17   : > { %210 = vst [vmem:[%s2175_s11 + $0x10] sm:$0xff] %v209_v2  ;;  %v217_v6 = vld [vmem:[%s2170_s10 + $0x60] sm:$0xff]  ;;  %v219_v7 = vld [vmem:[%s2170_s10 + $0x68] sm:$0xff] }
  0x18   : > { %212 = vst [vmem:[%s2175_s11 + $0x18] sm:$0xff] %v211_v3  ;;  %v221_v8 = vld [vmem:[%s2170_s10 + $0x80] sm:$0xff]  ;;  %v223_v9 = vld [vmem:[%s2170_s10 + $0x88] sm:$0xff] }
  0x19   : > { %214 = vst [vmem:[%s2175_s11 + $0x20] sm:$0xff] %v213_v4  ;;  %v225_v10 = vld [vmem:[%s2170_s10 + $0xa0] sm:$0xff]  ;;  %v227_v11 = vld [vmem:[%s2170_s10 + $0xa8] sm:$0xff] }
  0x1a   : > { %216 = vst [vmem:[%s2175_s11 + $0x28] sm:$0xff] %v215_v5  ;;  %v229_v12 = vld [vmem:[%s2170_s10 + $0xc0] sm:$0xff]  ;;  %v231_v13 = vld [vmem:[%s2170_s10 + $0xc8] sm:$0xff] }
  0x1b   : > { %218 = vst [vmem:[%s2175_s11 + $0x30] sm:$0xff] %v217_v6  ;;  %v233_v14 = vld [vmem:[%s2170_s10 + $0xe0] sm:$0xff]  ;;  %v235_v15 = vld [vmem:[%s2170_s10 + $0xe8] sm:$0xff] }
  0x1c   : > { %220 = vst [vmem:[%s2175_s11 + $0x38] sm:$0xff] %v219_v7  ;;  %v237_v16 = vld [vmem:[%s2170_s10 + $0x100] sm:$0xff]  ;;  %v239_v17 = vld [vmem:[%s2170_s10 + $0x108] sm:$0xff] }
  0x1d   : > { %222 = vst [vmem:[%s2175_s11 + $0x40] sm:$0xff] %v221_v8  ;;  %v241_v18 = vld [vmem:[%s2170_s10 + $0x120] sm:$0xff]  ;;  %v243_v19 = vld [vmem:[%s2170_s10 + $0x128] sm:$0xff] }
  0x1e   : > { %224 = vst [vmem:[%s2175_s11 + $0x48] sm:$0xff] %v223_v9  ;;  %v245_v20 = vld [vmem:[%s2170_s10 + $0x140] sm:$0xff]  ;;  %v247_v21 = vld [vmem:[%s2170_s10 + $0x148] sm:$0xff] }
  0x1f   : > { %226 = vst [vmem:[%s2175_s11 + $0x50] sm:$0xff] %v225_v10  ;;  %v249_v22 = vld [vmem:[%s2170_s10 + $0x160] sm:$0xff]  ;;  %v251_v23 = vld [vmem:[%s2170_s10 + $0x168] sm:$0xff] }
  0x20   : > { %228 = vst [vmem:[%s2175_s11 + $0x58] sm:$0xff] %v227_v11 }
  0x21   : > { %230 = vst [vmem:[%s2175_s11 + $0x60] sm:$0xff] %v229_v12 }
  0x22   : > { %232 = vst [vmem:[%s2175_s11 + $0x68] sm:$0xff] %v231_v13 }
  0x23   : > { %234 = vst [vmem:[%s2175_s11 + $0x70] sm:$0xff] %v233_v14 }
  0x24   : > { %236 = vst [vmem:[%s2175_s11 + $0x78] sm:$0xff] %v235_v15 }
  0x25   : > { %238 = vst [vmem:[%s2175_s11 + $0x80] sm:$0xff] %v237_v16 }
  0x26   : > { %240 = vst [vmem:[%s2175_s11 + $0x88] sm:$0xff] %v239_v17 }
  0x27   : > { %242 = vst [vmem:[%s2175_s11 + $0x90] sm:$0xff] %v241_v18 }
  0x28   : > { %244 = vst [vmem:[%s2175_s11 + $0x98] sm:$0xff] %v243_v19 }
  0x29   : > { %246 = vst [vmem:[%s2175_s11 + $0xa0] sm:$0xff] %v245_v20 }
  0x2a   : > { %248 = vst [vmem:[%s2175_s11 + $0xa8] sm:$0xff] %v247_v21 }
  0x2b   : > { %250 = vst [vmem:[%s2175_s11 + $0xb0] sm:$0xff] %v249_v22 }
  0x2c   : > { %252 = vst [vmem:[%s2175_s11 + $0xb8] sm:$0xff] %v251_v23 }
  0x2d PF: > { %p1783_p10 = scmp.ge.s32.totalorder %s2083_s21, 1  ;;  %p265_p11 = scmp.lt.s32.totalorder %s2083_s21, 3 }
  0x2f   : > { %p266_p12 = pnand %p1783_p10, %p265_p11 }
  0x31   : > { %269 = sbr.rel (%p266_p12) target bundleno = 722 (0x2d2), region = 59 }
  0x36   : > { %v693_v24 = vld [vmem:[%s3112_s4 + $0x70] sm:$0xff]  ;;  %v692_v25 = vld [vmem:[%s3112_s4 + $0x68] sm:$0xff]  ;;  %s2231_s16 = sand.u32 1, %s2075_s19   ;;  %v2085_v26 = vmov 0   ;;  %v694_v27 = vld [vmem:[%s3112_s4 + $0x78] sm:$0xff]  ;;  %vm871_vm0 = vcmask 916480  }
  0x37   : > { %2003 = vset.pattern.permute.xlu1 %v2085_v26  ;;  %2004 = vset.pattern.permute.xlu2 %v2085_v26  ;;  %s1961_s17 = smul.u32 192, %s2231_s16  ;;  %v707_v35 = vld [vmem:[%s3112_s4 + $0xe0] sm:$0xff]  ;;  %v706_v57 = vld [vmem:[%s3112_s4 + $0xd8] sm:$0xff]  ;;  %v705_v7 = vld [vmem:[%s3112_s4 + $0xd0] sm:$0xff]  ;;  %s3067_s8 = sshll.u32 %s1777_s22, 1  ;;  %vm1660_vm1 = vcmask 1040384  }
  0x38   : > { %783 = vperm.xlu1 %2003, %v693_v24   ;;  %778 = vperm.xlu2 %2004, %v692_v25   ;;  %v708_v17 = vld [vmem:[%s3112_s4 + $0xe8] sm:$0xff]  ;;  %v690_v18 = vld [vmem:[%s3112_s4 + $0x58] sm:$0xff]  ;;  %p305_p13 = scmp.lt.s32.totalorder %s3067_s8, 3  ;;  %s1784_s12 = sshll.u32 %s2231_s16, 1 }
  0x39   : > { %2002 = vset.pattern.permute.xlu0 %v2085_v26  ;;  %s2237_s26 = scalar_lea.vmem [#allocation3], %s1961_s17  ;;  %s1699_s15 = scalar_lea.hbm %s3113_s5, %s3067_s8 }
  0x3a   : > { %v2240_v28 = vld [vmem:[%s2237_s26 + $0x30] sm:$0xff]  ;;  %v2246_v30 = vld [vmem:[%s2237_s26 + $0x38] sm:$0xff]  ;;  %788 = vperm.xlu0 %2002, %v694_v27   ;;  %v2254_v33 = vld [vmem:[%s2237_s26 + $0x20] sm:$0xff]  ;;  %s306_s9 = scalar_select %p305_p13, %s3067_s8, 3 }
  0x3b   : > { %v2243_v29 = vld [vmem:[%s2237_s26 + $0x90] sm:$0xff]  ;;  %v2251_v32 = vld [vmem:[%s2237_s26 + $0x98] sm:$0xff]  ;;  %v2257_v34 = vld [vmem:[%s2237_s26 + $0x80] sm:$0xff]  ;;  %s302_s17 = scalar_lea.vmem [#allocation4], %s1784_s12  ;;  %s1703_s25 = sshll.u32 %s1699_s15, 4  ;;  %s1704_s25 = int_to_ptr.hbm [resolvable:$true] %s1703_s25 }
  0x3c   : > { %v437_v31 = vmul.f32 %v2243_v29, %v2240_v28  ;;  %v438_v36 = vmul.f32 %v2251_v32, %v2246_v30  ;;  %v435_v37 = vmul.f32 %v2257_v34, %v2254_v33  ;;  %v2267_v38 = vld [vmem:[%s2237_s26 + $0x28] sm:$0xff]  ;;  %v2273_v40 = vld [vmem:[%s2237_s26 + $0x70] sm:$0xff]  ;;  %v2280_v43 = vld [vmem:[%s2237_s26 + $0x78] sm:$0xff]  ;;  %s307_s22 = scalar_lea.vmem %s3109_s1, %s306_s9  ;;  %s1701_s23 = sshll.u32 %s302_s17, 4  ;;  %s1702_s23 = int_to_ptr.vmem [resolvable:$true] %s1701_s23 }
  0x3d   : > { %v2270_v39 = vld [vmem:[%s2237_s26 + $0x88] sm:$0xff]  ;;  %v421_v42 = vmul.f32 %v2240_v28, %v2273_v40  ;;  %v2283_v44 = vld [vmem:[%s2237_s26 + $0x60] sm:$0xff]  ;;  %v2286_v45 = vld [vmem:[%s2237_s26 + $0xb0] sm:$0xff]  ;;  %v422_v46 = vmul.f32 %v2246_v30, %v2280_v43  ;;  %v517_v14 = vmul.f32 %v2243_v29, %v2273_v40  ;;  %v518_v16 = vmul.f32 %v2251_v32, %v2280_v43  ;;  %s2035_s30 = sshra.s32 %s1704_s25, 4  ;;  %s2041_s9 = scalar_lea.hbm %s3113_s5, 4  ;;  %s2036_s30 = int_to_ptr.hbm [resolvable:$true] %s2035_s30 }
  0x3e   : > { %968 = vmatpush.msra.mxu0 %v437_v31  ;;  %v436_v41 = vmul.f32 %v2270_v39, %v2267_v38  ;;  %1194 = vmatpush.msra.mxu2 %v438_v36  ;;  %v549_v47 = vmul.f32 %v2286_v45, %v2243_v29  ;;  %v2293_v48 = vld [vmem:[%s2237_s26 + $0x68] sm:$0xff]  ;;  %v2296_v49 = vld [vmem:[%s2237_s26 + $0xb8] sm:$0xff]  ;;  %v2299_v50 = vld [vmem:[%s2237_s26 + $0x50] sm:$0xff]  ;;  %v419_v51 = vmul.f32 %v2254_v33, %v2283_v44  ;;  %s2037_s6 = scalar_lea.hbm %s2036_s30, 2  ;;  %p2042_p3 = scmp.lt.s32.totalorder %s2036_s30, %s3113_s5 }
  0x3f   : > { %v550_v52 = vmul.f32 %v2296_v49, %v2251_v32  ;;  %v2306_v53 = vld [vmem:[%s2237_s26 + $0xa0] sm:$0xff]  ;;  %v2309_v54 = vld [vmem:[%s2237_s26 + $0x58] sm:$0xff]  ;;  %v2312_v55 = vld [vmem:[%s2237_s26 + $0xa8] sm:$0xff]  ;;  %v420_v56 = vmul.f32 %v2267_v38, %v2293_v48  ;;  %v405_v60 = vmul.f32 %v2240_v28, %v2299_v50  ;;  %v533_v0 = vmul.f32 %v2286_v45, %v2273_v40  ;;  %p2038_p0 = scmp.ne.s32.totalorder %s2036_s30, %s2037_s6  ;;  %p2043_p4 = scmp.lt.s32.totalorder %s2041_s9, %s2037_s6 }
  0x40   : > { %969 = vmatpush.msra.mxu0 %v435_v37  ;;  %1195 = vmatpush.msra.mxu2 %v436_v41  ;;  %v547_v58 = vmul.f32 %v2306_v53, %v2257_v34  ;;  %v2322_v59 = vld [vmem:[%s2237_s26 + $0x40] sm:$0xff]  ;;  %v548_v61 = vmul.f32 %v2312_v55, %v2270_v39  ;;  %v2329_v62 = vld [vmem:[%s2237_s26 + $0x48] sm:$0xff]  ;;  %v406_v63 = vmul.f32 %v2246_v30, %v2309_v54  ;;  %v2336_v1 = vld [vmem:[%s2237_s26 + $0x10] sm:$0xff] }
  0x41   : > { %853 = vperm.xlu1 %2003, %v707_v35   ;;  %1083 = vmatpush.msra.mxu1 %v549_v47  ;;  %v403_v2 = vmul.f32 %v2254_v33, %v2322_v59  ;;  %v534_v3 = vmul.f32 %v2296_v49, %v2280_v43  ;;  %v2343_v4 = vld [vmem:[%s2237_s26 + $0x18] sm:$0xff]  ;;  %v404_v5 = vmul.f32 %v2267_v38, %v2329_v62  ;;  %v2348_v6 = vld [vmem:[%s2237_s26] sm:$0xff]  ;;  %v2358_v10 = vld [vmem:[%s2237_s26 + $0x8] sm:$0xff]  ;;  %s1689_s26 = scalar_lea.sflag [#allocation5], %s2231_s16  ;;  %p2039_p1 = pnand %p2038_p0, %p2154_p6 }
  0x42   : > { %970 = vmatpush.msra.mxu0 %v421_v42  ;;  %1196 = vmatpush.msra.mxu2 %v422_v46  ;;  %v389_v8 = vmul.f32 %v2286_v45, %v2336_v1  ;;  %v531_v9 = vmul.f32 %v2306_v53, %v2283_v44  ;;  %v390_v11 = vmul.f32 %v2296_v49, %v2343_v4  ;;  %v689_v31 = vld [vmem:[%s3112_s4 + $0x50] sm:$0xff]  ;;  %p2044_p5 = por %p2043_p4, %p2042_p3 }
  0x43   : > { %1309 = vmatpush.msra.mxu3 %v550_v52  ;;  %848 = vperm.xlu2 %2004, %v706_v57   ;;  %v532_v12 = vmul.f32 %v2312_v55, %v2293_v48  ;;  %v387_v13 = vmul.f32 %v2306_v53, %v2348_v6  ;;  %v388_v15 = vmul.f32 %v2312_v55, %v2358_v10  ;;  %p2040_p2 = pneg %p2039_p1 }
  0x44   : > { %971 = vmatpush.msra.mxu0 %v419_v51  ;;  %1197 = vmatpush.msra.mxu2 %v420_v56  ;;  %v372_v19 = vmul.f32 %v2243_v29, %v2336_v1  ;;  %v515_v20 = vmul.f32 %v2257_v34, %v2283_v44  ;;  %v373_v21 = vmul.f32 %v2251_v32, %v2343_v4  ;;  %v691_v51 = vld [vmem:[%s3112_s4 + $0x60] sm:$0xff] }
  0x45   : > { %1084 = vmatpush.msra.mxu1 %v547_v58  ;;  %1310 = vmatpush.msra.mxu3 %v548_v61  ;;  %v516_v22 = vmul.f32 %v2270_v39, %v2293_v48  ;;  %v370_v23 = vmul.f32 %v2257_v34, %v2348_v6  ;;  %v501_v24 = vmul.f32 %v2286_v45, %v2299_v50  ;;  %p2045_p7 = pnand %p2044_p5, %p2040_p2 }
  0x46   : > { %972 = vmatpush.msra.mxu0 %v405_v60  ;;  %1198 = vmatpush.msra.mxu2 %v406_v63  ;;  %v371_v25 = vmul.f32 %v2270_v39, %v2358_v10  ;;  %v502_v26 = vmul.f32 %v2296_v49, %v2309_v54  ;;  %v355_v27 = vmul.f32 %v2273_v40, %v2336_v1 }
  0x47   : > { %1085 = vmatpush.msra.mxu1 %v533_v0  ;;  %1311 = vmatpush.msra.mxu3 %v534_v3  ;;  %v499_v35 = vmul.f32 %v2306_v53, %v2322_v59  ;;  %v356_v36 = vmul.f32 %v2280_v43, %v2343_v4  ;;  %v500_v37 = vmul.f32 %v2312_v55, %v2329_v62  ;;  %v559_v3 = vld [vmem:[%s3110_s2 + $0x20] sm:$0xff] }
  0x48   : > { %973 = vmatpush.msra.mxu0 %v403_v2  ;;  %1199 = vmatpush.msra.mxu2 %v404_v5  ;;  %v353_v41 = vmul.f32 %v2283_v44, %v2348_v6  ;;  %v485_v42 = vmul.f32 %v2243_v29, %v2299_v50  ;;  %v354_v46 = vmul.f32 %v2293_v48, %v2358_v10  ;;  %v703_v29 = vld [vmem:[%s3112_s4 + $0xc0] sm:$0xff]  ;;  %v684_v5 = vld [vmem:[%s3112_s4 + $0x28] sm:$0xff] }
  0x49   : > { %843 = vperm.xlu1 %2003, %v705_v7   ;;  %1086 = vmatpush.msra.mxu1 %v531_v9  ;;  %v486_v47 = vmul.f32 %v2251_v32, %v2309_v54  ;;  %v338_v52 = vmul.f32 %v2299_v50, %v2336_v1  ;;  %v483_v56 = vmul.f32 %v2257_v34, %v2322_v59  ;;  %v699_v2 = vld [vmem:[%s3112_s4 + $0xa0] sm:$0xff]  ;;  %v685_v9 = vld [vmem:[%s3112_s4 + $0x30] sm:$0xff] }
  0x4a   : > { %974 = vmatpush.msra.mxu0 %v389_v8  ;;  %1200 = vmatpush.msra.mxu2 %v390_v11  ;;  %v339_v32 = vmul.f32 %v2309_v54, %v2343_v4  ;;  %v484_v57 = vmul.f32 %v2270_v39, %v2329_v62  ;;  %v336_v58 = vmul.f32 %v2322_v59, %v2348_v6  ;;  %v702_v39 = vld [vmem:[%s3112_s4 + $0xb8] sm:$0xff]  ;;  %v683_v7 = vld [vmem:[%s3112_s4 + $0x20] sm:$0xff]  ;;  %v561_v8 = vld [vmem:[%s3110_s2 + $0x30] sm:$0xff] }
  0x4b   : > { %1312 = vmatpush.msra.mxu3 %v532_v12  ;;  %1087 = vmatpush.msra.mxu1 %v517_v14  ;;  %v469_v60 = vmul.f32 %v2273_v40, %v2299_v50  ;;  %v337_v61 = vmul.f32 %v2329_v62, %v2358_v10  ;;  %v470_v34 = vmul.f32 %v2280_v43, %v2309_v54  ;;  %v562_v11 = vld [vmem:[%s3110_s2 + $0x38] sm:$0xff]  ;;  %v696_v12 = vld [vmem:[%s3112_s4 + $0x88] sm:$0xff] }
  0x4c   : > { %975 = vmatpush.msra.mxu0 %v387_v13  ;;  %1201 = vmatpush.msra.mxu2 %v388_v15  ;;  %v321_v63 = vmul.f32 %v2240_v28, %v2336_v1  ;;  %v467_v40 = vmul.f32 %v2283_v44, %v2322_v59  ;;  %v322_v50 = vmul.f32 %v2246_v30, %v2343_v4  ;;  %v686_v1 = vld [vmem:[%s3112_s4 + $0x38] sm:$0xff]  ;;  %v701_v4 = vld [vmem:[%s3112_s4 + $0xb0] sm:$0xff]  ;;  %v563_v13 = vld [vmem:[%s3110_s2 + $0x40] sm:$0xff] }
  0x4d   : > { %1313 = vmatpush.msra.mxu3 %v518_v16  ;;  %858 = vperm.xlu0 %2002, %v708_v17   ;;  %v468_v43 = vmul.f32 %v2293_v48, %v2329_v62  ;;  %v319_v54 = vmul.f32 %v2254_v33, %v2348_v6  ;;  %v453_v0 = vmul.f32 %v2286_v45, %v2240_v28  ;;  %v555_v48 = vld [vmem:[%s3110_s2] sm:$0xff]  ;;  %v704_v28 = vld [vmem:[%s3112_s4 + $0xc8] sm:$0xff]  ;;  %v698_v14 = vld [vmem:[%s3112_s4 + $0x98] sm:$0xff] }
  0x4e   : > { %768 = vperm.xlu2 %2004, %v690_v18   ;;  %976 = vmatpush.msra.mxu0 %v372_v19  ;;  %v320_v44 = vmul.f32 %v2267_v38, %v2358_v10  ;;  %v454_v59 = vmul.f32 %v2296_v49, %v2246_v30  ;;  %v687_v45 = vld [vmem:[%s3112_s4 + $0x40] sm:$0xff]  ;;  %v451_v30 = vmul.f32 %v2306_v53, %v2254_v33  ;;  %v556_v62 = vld [vmem:[%s3110_s2 + $0x8] sm:$0xff]  ;;  %v557_v33 = vld [vmem:[%s3110_s2 + $0x10] sm:$0xff] }
  0x4f   : > { %1088 = vmatpush.msra.mxu1 %v515_v20  ;;  %1202 = vmatpush.msra.mxu2 %v373_v21  ;;  %v452_v49 = vmul.f32 %v2312_v55, %v2267_v38  ;;  %v688_v38 = vld [vmem:[%s3112_s4 + $0x48] sm:$0xff]  ;;  %v558_v55 = vld [vmem:[%s3110_s2 + $0x18] sm:$0xff]  ;;  %v697_v10 = vld [vmem:[%s3112_s4 + $0x90] sm:$0xff] }
  0x50   : > { %1314 = vmatpush.msra.mxu3 %v516_v22  ;;  %977 = vmatpush.msra.mxu0 %v370_v23  ;;  %v700_v53 = vld [vmem:[%s3112_s4 + $0xa8] sm:$0xff]  ;;  %v681_v15 = vld [vmem:[%s3112_s4 + $0x10] sm:$0xff]  ;;  %v682_v19 = vld [vmem:[%s3112_s4 + $0x18] sm:$0xff] }
  0x51   : > { %1089 = vmatpush.msra.mxu1 %v501_v24  ;;  %1203 = vmatpush.msra.mxu2 %v371_v25  ;;  %v560_v6 = vld [vmem:[%s3110_s2 + $0x28] sm:$0xff]  ;;  %v565_v18 = vld [vmem:[%s3110_s2 + $0x50] sm:$0xff]  ;;  %v679_v20 = vld [vmem:[%s3112_s4] sm:$0xff] }
  0x52   : > { %1315 = vmatpush.msra.mxu3 %v502_v26  ;;  %763 = vperm.xlu1 %2003, %v689_v31   ;;  %v564_v16 = vld [vmem:[%s3110_s2 + $0x48] sm:$0xff]  ;;  %v566_v21 = vld [vmem:[%s3110_s2 + $0x58] sm:$0xff]  ;;  %v567_v22 = vld [vmem:[%s3110_s2 + $0x60] sm:$0xff] }
  0x53   : > { %978 = vmatpush.msra.mxu0 %v355_v27  ;;  %1090 = vmatpush.msra.mxu1 %v499_v35  ;;  %v680_v17 = vld [vmem:[%s3112_s4 + $0x8] sm:$0xff]  ;;  %v569_v25 = vld [vmem:[%s3110_s2 + $0x70] sm:$0xff]  ;;  %v570_v26 = vld [vmem:[%s3110_s2 + $0x78] sm:$0xff] }
  0x54   : > { %1204 = vmatpush.msra.mxu2 %v356_v36  ;;  %1316 = vmatpush.msra.mxu3 %v500_v37  ;;  %v568_v23 = vld [vmem:[%s3110_s2 + $0x68] sm:$0xff]  ;;  %v571_v27 = vld [vmem:[%s3110_s2 + $0x80] sm:$0xff]  ;;  %v573_v36 = vld [vmem:[%s3110_s2 + $0x90] sm:$0xff] }
  0x55   : > { %979 = vmatpush.msra.mxu0 %v353_v41  ;;  %1091 = vmatpush.msra.mxu1 %v485_v42  ;;  %v572_v35 = vld [vmem:[%s3110_s2 + $0x88] sm:$0xff]  ;;  %v574_v41 = vld [vmem:[%s3110_s2 + $0x98] sm:$0xff] }
  0x56   : > { %1205 = vmatpush.msra.mxu2 %v354_v46  ;;  %1317 = vmatpush.msra.mxu3 %v486_v47  ;;  %v575_v46 = vld [vmem:[%s3110_s2 + $0xa0] sm:$0xff]  ;;  %v576_v47 = vld [vmem:[%s3110_s2 + $0xa8] sm:$0xff] }
  0x57   : > { %773 = vperm.xlu0 %2002, %v691_v51   ;;  %833 = vperm.xlu2 %2004, %v703_v29   ;;  %v577_v29 = vld [vmem:[%s3110_s2 + $0xb0] sm:$0xff] }
  0x58   : > { %980 = vmatpush.msra.mxu0 %v338_v52  ;;  %1092 = vmatpush.msra.mxu1 %v483_v56 }
  0x59   : > { %1206 = vmatpush.msra.mxu2 %v339_v32  ;;  %1318 = vmatpush.msra.mxu3 %v484_v57  ;;  %v578_v32 = vld [vmem:[%s3110_s2 + $0xb8] sm:$0xff] }
  0x5a   : > { %981 = vmatpush.msra.mxu0 %v336_v58  ;;  %1093 = vmatpush.msra.mxu1 %v469_v60  ;;  %v579_v60 = vld [vmem:[%s3110_s2 + $0xc0] sm:$0xff] }
  0x5b   : > { %1207 = vmatpush.msra.mxu2 %v337_v61  ;;  %1319 = vmatpush.msra.mxu3 %v470_v34  ;;  %v580_v34 = vld [vmem:[%s3110_s2 + $0xc8] sm:$0xff] }
  0x5c   : > { %828 = vperm.xlu1 %2003, %v702_v39   ;;  %982 = vmatpush.msra.mxu0 %v321_v63 }
  0x5d   : > { %1094 = vmatpush.msra.mxu1 %v467_v40  ;;  %1208 = vmatpush.msra.mxu2 %v322_v50  ;;  %v581_v40 = vld [vmem:[%s3110_s2 + $0xd0] sm:$0xff]  ;;  %v582_v50 = vld [vmem:[%s3110_s2 + $0xd8] sm:$0xff] }
  0x5e   : > { %1320 = vmatpush.msra.mxu3 %v468_v43  ;;  %983 = vmatpush.msra.mxu0 %v319_v54 }
  0x5f   : > { %1095 = vmatpush.msra.mxu1 %v453_v0  ;;  %1209 = vmatpush.msra.mxu2 %v320_v44  ;;  %v583_v44 = vld [vmem:[%s3110_s2 + $0xe0] sm:$0xff] }
  0x60   : > { %1321 = vmatpush.msra.mxu3 %v454_v59  ;;  %984 = vmatmul.f32.vlgmr.msra.gmra.mxu0 %v555_v48  ;;  %v584_v59 = vld [vmem:[%s3110_s2 + $0xe8] sm:$0xff] }
  0x61   : > { %1210 = vmatmul.f32.vlgmr.msra.gmra.mxu2 %v555_v48  ;;  %838 = vperm.xlu0 %2002, %v704_v28   ;;  %v695_v48 = vld [vmem:[%s3112_s4 + $0x80] sm:$0xff] }
  0x62   : > { %753 = vperm.xlu2 %2004, %v687_v45   ;;  %1096 = vmatpush.msra.mxu1 %v451_v30  ;;  %v585_v30 = vld [vmem:[%s3110_s2 + $0xf0] sm:$0xff] }
  0x63   : > { %1322 = vmatpush.msra.mxu3 %v452_v49  ;;  %1886 = vmatmul.msk.f32.vlgmr.msra.gmra.mxu1 %vm871_vm0, %v556_v62 }
  0x64   : > { %1918 = vmatmul.msk.f32.vlgmr.msra.gmra.mxu3 %vm871_vm0, %v556_v62  ;;  %748 = vperm.xlu1 %2003, %v686_v1   ;;  %v586_v62 = vld [vmem:[%s3110_s2 + $0xf8] sm:$0xff] }
  0x68   : > { %987 = vmatmul.f32.gmra.mxu0 %v557_v33 }
  0x69   : > { %1213 = vmatmul.f32.gmra.mxu2 %v557_v33  ;;  %758 = vperm.xlu0 %2002, %v688_v38  }
  0x6a   : > { %818 = vperm.xlu2 %2004, %v700_v53   ;;  %v587_v53 = vld [vmem:[%s3110_s2 + $0x100] sm:$0xff] }
  0x6b   : > { %1887 = vmatmul.msk.f32.gmra.mxu1 %vm871_vm0, %v558_v55 }
  0x6c   : > { %1919 = vmatmul.msk.f32.gmra.mxu3 %vm871_vm0, %v558_v55  ;;  %813 = vperm.xlu1 %2003, %v699_v2  }
  0x70   : > { %990 = vmatmul.f32.gmra.mxu0 %v559_v3 }
  0x71   : > { %1216 = vmatmul.f32.gmra.mxu2 %v559_v3  ;;  %823 = vperm.xlu0 %2002, %v701_v4   ;;  %v588_v3 = vld [vmem:[%s3110_s2 + $0x108] sm:$0xff] }
  0x72   : > { %738 = vperm.xlu2 %2004, %v684_v5  }
  0x73   : > { %1888 = vmatmul.msk.f32.gmra.mxu1 %vm871_vm0, %v560_v6 }
  0x74   : > { %1920 = vmatmul.msk.f32.gmra.mxu3 %vm871_vm0, %v560_v6  ;;  %733 = vperm.xlu1 %2003, %v683_v7  }
  0x78   : > { %993 = vmatmul.f32.gmra.mxu0 %v561_v8 }
  0x79   : > { %1219 = vmatmul.f32.gmra.mxu2 %v561_v8  ;;  %743 = vperm.xlu0 %2002, %v685_v9  }
  0x7a   : > { %803 = vperm.xlu2 %2004, %v697_v10   ;;  %v589_v10 = vld [vmem:[%s3110_s2 + $0x110] sm:$0xff] }
  0x7b   : > { %1889 = vmatmul.msk.f32.gmra.mxu1 %vm871_vm0, %v562_v11 }
  0x7c   : > { %1921 = vmatmul.msk.f32.gmra.mxu3 %vm871_vm0, %v562_v11  ;;  %798 = vperm.xlu1 %2003, %v696_v12  }
  0x80   : > { %996 = vmatmul.f32.gmra.mxu0 %v563_v13 }
  0x81   : > { %1222 = vmatmul.f32.gmra.mxu2 %v563_v13  ;;  %808 = vperm.xlu0 %2002, %v698_v14  }
  0x82   : > { %723 = vperm.xlu2 %2004, %v681_v15  }
  0x83   : > { %1890 = vmatmul.msk.f32.gmra.mxu1 %vm871_vm0, %v564_v16 }
  0x84   : > { %1922 = vmatmul.msk.f32.gmra.mxu3 %vm871_vm0, %v564_v16  ;;  %718 = vperm.xlu1 %2003, %v680_v17   ;;  %v590_v16 = vld [vmem:[%s3110_s2 + $0x118] sm:$0xff] }
  0x88   : > { %999 = vmatmul.f32.gmra.mxu0 %v565_v18 }
  0x89   : > { %1225 = vmatmul.f32.gmra.mxu2 %v565_v18  ;;  %728 = vperm.xlu0 %2002, %v682_v19  }
  0x8a   : > { %713 = vperm.xlu2 %2004, %v679_v20   ;;  %v591_v20 = vld [vmem:[%s3110_s2 + $0x120] sm:$0xff] }
  0x8b   : > { %1891 = vmatmul.msk.f32.gmra.mxu1 %vm871_vm0, %v566_v21 }
  0x8c   : > { %1923 = vmatmul.msk.f32.gmra.mxu3 %vm871_vm0, %v566_v21 }
  0x90   : > { %1002 = vmatmul.f32.gmra.mxu0 %v567_v22 }
  0x91   : > { %1228 = vmatmul.f32.gmra.mxu2 %v567_v22  ;;  %793 = vperm.xlu0 %2002, %v695_v48  }
  0x92   : > { %v2565_v24 = vpop.permute.xlu2 %778 }
  0x93   : > { %1892 = vmatmul.msk.f32.gmra.mxu1 %vm871_vm0, %v568_v23 }
  0x94   : > { %1924 = vmatmul.msk.f32.gmra.mxu3 %vm871_vm0, %v568_v23 }
  0x98   : > { %1005 = vmatmul.f32.gmra.mxu0 %v569_v25 }
  0x99   : > { %1231 = vmatmul.f32.gmra.mxu2 %v569_v25  ;;  %v592_v25 = vld [vmem:[%s3110_s2 + $0x128] sm:$0xff] }
  0x9b   : > { %1893 = vmatmul.msk.f32.gmra.mxu1 %vm871_vm0, %v570_v26 }
  0x9c   : > { %1925 = vmatmul.msk.f32.gmra.mxu3 %vm871_vm0, %v570_v26 }
  0x9d   : > { %v2578_v31 = vpop.permute.xlu2 %848 }
  0x9e   : > { %3128 = vst [vmem:[#allocation7_spill] sm:$0xff] %v2578_v31 }
  0xa0   : > { %1008 = vmatmul.f32.gmra.mxu0 %v571_v27 }
  0xa1   : > { %1234 = vmatmul.f32.gmra.mxu2 %v571_v27 }
  0xa3   : > { %1894 = vmatmul.msk.f32.gmra.mxu1 %vm871_vm0, %v572_v35 }
  0xa4   : > { %1926 = vmatmul.msk.f32.gmra.mxu3 %vm871_vm0, %v572_v35 }
  0xa8   : > { %v2588_v37 = vpop.permute.xlu2 %768  ;;  %1011 = vmatmul.f32.gmra.mxu0 %v573_v36 }
  0xa9   : > { %1237 = vmatmul.f32.gmra.mxu2 %v573_v36 }
  0xaa   : > { %v2593_v42 = vpop.permute.xlu1 %783 }
  0xab   : > { %1895 = vmatmul.msk.f32.gmra.mxu1 %vm871_vm0, %v574_v41 }
  0xac   : > { %1927 = vmatmul.msk.f32.gmra.mxu3 %vm871_vm0, %v574_v41  ;;  %v2612_v56 = vpop.permute.xlu0 %788  ;;  %v593_v41 = vld [vmem:[%s3110_s2 + $0x130] sm:$0xff] }
  0xb0   : > { %1014 = vmatmul.f32.gmra.mxu0 %v575_v46 }
  0xb1   : > { %1240 = vmatmul.f32.gmra.mxu2 %v575_v46  ;;  %v2603_v51 = vpop.permute.xlu2 %833 }
  0xb2   : > { %3129 = vst [vmem:[#allocation8_spill] sm:$0xff] %v2603_v51  ;;  %v611_v51 = vld [vmem:[%s3110_s2 + $0x1c0] sm:$0xff] }
  0xb3   : > { %v2605_v52 = vpop.permute.xlu1 %853  ;;  %1896 = vmatmul.msk.f32.gmra.mxu1 %vm871_vm0, %v576_v47 }
  0xb4   : > { %3130 = vst [vmem:[#allocation9_spill] sm:$0xff] %v2605_v52  ;;  %1928 = vmatmul.msk.f32.gmra.mxu3 %vm871_vm0, %v576_v47 }
  0xb8   : > { %1017 = vmatmul.f32.gmra.mxu0 %v577_v29 }
  0xb9   : > { %1243 = vmatmul.f32.gmra.mxu2 %v577_v29 }
  0xbb   : > { %v2617_v57 = vpop.permute.xlu1 %843  ;;  %1897 = vmatmul.msk.f32.gmra.mxu1 %vm871_vm0, %v578_v32 }
  0xbc   : > { %3131 = vst [vmem:[#allocation10_spill] sm:$0xff] %v2617_v57  ;;  %1929 = vmatmul.msk.f32.gmra.mxu3 %vm871_vm0, %v578_v32  ;;  %v2621_v58 = vpop.permute.xlu2 %753 }
  0xbf   : > { %v2626_v61 = vpop.permute.xlu0 %858 }
  0xc0   : > { %3132 = vst [vmem:[#allocation11_spill] sm:$0xff] %v2626_v61  ;;  %1020 = vmatmul.f32.gmra.mxu0 %v579_v60  ;;  %v613_v61 = vld [vmem:[%s3110_s2 + $0x1d0] sm:$0xff] }
  0xc1   : > { %1246 = vmatmul.f32.gmra.mxu2 %v579_v60 }
  0xc3   : > { %1898 = vmatmul.msk.f32.gmra.mxu1 %vm871_vm0, %v580_v34 }
  0xc4   : > { %1930 = vmatmul.msk.f32.gmra.mxu3 %vm871_vm0, %v580_v34  ;;  %v2633_v39 = vpop.permute.xlu2 %818  ;;  %v2635_v63 = vpop.permute.xlu1 %763 }
  0xc5   : > { %3133 = vst [vmem:[#allocation12_spill] sm:$0xff] %v2633_v39 }
  0xc8   : > { %1023 = vmatmul.f32.gmra.mxu0 %v581_v40 }
  0xc9   : > { %1249 = vmatmul.f32.gmra.mxu2 %v581_v40  ;;  %v2643_v43 = vpop.permute.xlu0 %773  ;;  %v594_v40 = vld [vmem:[%s3110_s2 + $0x138] sm:$0xff] }
  0xcb   : > { %1899 = vmatmul.msk.f32.gmra.mxu1 %vm871_vm0, %v582_v50 }
  0xcc   : > { %1931 = vmatmul.msk.f32.gmra.mxu3 %vm871_vm0, %v582_v50  ;;  %v2647_v54 = vpop.permute.xlu2 %738 }
  0xce   : > { %v2649_v0 = vpop.permute.xlu1 %828 }
  0xcf   : > { %3134 = vst [vmem:[#allocation13_spill] sm:$0xff] %v2649_v0 }
  0xd0   : > { %1026 = vmatmul.f32.gmra.mxu0 %v583_v44 }
  0xd1   : > { %1252 = vmatmul.f32.gmra.mxu2 %v583_v44 }
  0xd3   : > { %1900 = vmatmul.msk.f32.gmra.mxu1 %vm871_vm0, %v584_v59  ;;  %v2662_v28 = vpop.permute.xlu0 %838 }
  0xd4   : > { %1932 = vmatmul.msk.f32.gmra.mxu3 %vm871_vm0, %v584_v59  ;;  %3135 = vst [vmem:[#allocation14_spill] sm:$0xff] %v2662_v28  ;;  %v2664_v45 = vpop.permute.xlu2 %803 }
  0xd5   : > { %3136 = vst [vmem:[#allocation15_spill] sm:$0xff] %v2664_v45 }
  0xd6   : > { %v2669_v49 = vpop.permute.xlu1 %748 }
  0xd8   : > { %1029 = vmatmul.f32.gmra.mxu0 %v585_v30 }
  0xd9   : > { %1255 = vmatmul.f32.gmra.mxu2 %v585_v30 }
  0xdb   : > { %1901 = vmatmul.msk.f32.gmra.mxu1 %vm871_vm0, %v586_v62  ;;  %v2676_v1 = vpop.permute.xlu0 %758 }
  0xdc   : > { %1933 = vmatmul.msk.f32.gmra.mxu3 %vm871_vm0, %v586_v62  ;;  %v2678_v33 = vpop.permute.xlu2 %723 }
  0xdd   : > { %v985_v38 = vpop.f32.mrf.mxu0 }
  0xde   : > { %v2683_v55 = vpop.permute.xlu1 %813 }
  0xdf   : > { %3137 = vst [vmem:[#allocation16_spill] sm:$0xff] %v2683_v55 }
  0xe0   : > { %v1098_v2 = vpop.f32.mrf.mxu1  ;;  %1032 = vmatmul.f32.gmra.mxu0 %v587_v53 }
  0xe1   : > { %1258 = vmatmul.f32.gmra.mxu2 %v587_v53  ;;  %v595_v53 = vld [vmem:[%s3110_s2 + $0x140] sm:$0xff] }
  0xe3   : > { %1902 = vmatmul.msk.f32.gmra.mxu1 %vm871_vm0, %v588_v3  ;;  %v2690_v4 = vpop.permute.xlu0 %823 }
  0xe4   : > { %1934 = vmatmul.msk.f32.gmra.mxu3 %vm871_vm0, %v588_v3  ;;  %3138 = vst [vmem:[#allocation17_spill] sm:$0xff] %v2690_v4  ;;  %v714_v5 = vpop.permute.xlu2 %713  ;;  %v1211_v7 = vpop.f32.mrf.mxu2 }
  0xe5   : > { %v986_v6 = vadd.f32 %v985_v38, %v714_v5  ;;  %v1212_v8 = vadd.f32 %v1211_v7, %v714_v5  ;;  %v988_v9 = vpop.f32.mrf.mxu0  ;;  %v596_v7 = vld [vmem:[%s3110_s2 + $0x148] sm:$0xff] }
  0xe6   : > { %v2695_v12 = vpop.permute.xlu1 %733 }
  0xe7   : > { %v1324_v11 = vpop.f32.mrf.mxu3  ;;  %v2697_v13 = vadd.f32 %v1098_v2, %v986_v6 }
  0xe8   : > { %v2699_v14 = vadd.f32 %v1324_v11, %v1212_v8  ;;  %v1101_v15 = vpop.f32.mrf.mxu1  ;;  %1035 = vmatmul.f32.gmra.mxu0 %v589_v10  ;;  %v1484_v8 = vld [vmem:[%s3112_s4 + $0x100] sm:$0xff] }
  0xe9   : > { %3139 = vst [vmem:[#allocation18_spill] sm:$0xff] %v2697_v13  ;;  %1261 = vmatmul.f32.gmra.mxu2 %v589_v10  ;;  %1488 = vperm.xlu0 %2002, %v1484_v8   ;;  %v617_v13 = vld [vmem:[%s3110_s2 + $0x1f0] sm:$0xff] }
  0xea   : > { %3140 = vst [vmem:[#allocation19_spill] sm:$0xff] %v2699_v14  ;;  %v615_v14 = vld [vmem:[%s3110_s2 + $0x1e0] sm:$0xff] }
  0xeb   : > { %1903 = vmatmul.msk.f32.gmra.mxu1 %vm871_vm0, %v590_v16  ;;  %v2706_v17 = vpop.permute.xlu0 %743 }
  0xec   : > { %1935 = vmatmul.msk.f32.gmra.mxu3 %vm871_vm0, %v590_v16  ;;  %v1214_v18 = vpop.f32.mrf.mxu2 }
  0xed   : > { %v2708_v19 = vpop.f32.mrf.mxu0 }
  0xee   : > { %v2713_v22 = vpop.permute.xlu1 %798 }
  0xef   : > { %v1327_v21 = vpop.f32.mrf.mxu3 }
  0xf0   : > { %v2715_v23 = vpop.f32.mrf.mxu1  ;;  %1038 = vmatmul.f32.gmra.mxu0 %v591_v20 }
  0xf1   : > { %3141 = vst [vmem:[#allocation20_spill] sm:$0xff] %v2715_v23  ;;  %1264 = vmatmul.f32.gmra.mxu2 %v591_v20 }
  0xf3   : > { %1904 = vmatmul.msk.f32.gmra.mxu1 %vm871_vm0, %v592_v25  ;;  %v2722_v26 = vpop.permute.xlu0 %808 }
  0xf4   : > { %1936 = vmatmul.msk.f32.gmra.mxu3 %vm871_vm0, %v592_v25  ;;  %3142 = vst [vmem:[#allocation21_spill] sm:$0xff] %v2722_v26  ;;  %v1217_v27 = vpop.f32.mrf.mxu2  ;;  %v710_v25 = vld [vmem:[%s3112_s4 + $0xf8] sm:$0xff] }
  0xf5   : > { %v1218_v35 = vadd.f32 %v1217_v27, %v2678_v33  ;;  %v994_v36 = vpop.f32.mrf.mxu0  ;;  %868 = vperm.xlu0 %2002, %v710_v25  }
  0xf6   : > { %v719_v47 = vpop.permute.xlu1 %718 }
  0xf7   : > { %v1330_v46 = vpop.f32.mrf.mxu3  ;;  %v989_v32 = vadd.f32 %v988_v9, %v719_v47  ;;  %v1215_v60 = vadd.f32 %v1214_v18, %v719_v47 }
  0xf8   : > { %v2728_v29 = vadd.f32 %v1330_v46, %v1218_v35  ;;  %v1107_v34 = vpop.f32.mrf.mxu1  ;;  %1041 = vmatmul.f32.gmra.mxu0 %v593_v41  ;;  %v1485_v46 = vld [vmem:[%s3112_s4 + $0x108] sm:$0xff] }
  0xf9   : > { %1267 = vmatmul.f32.gmra.mxu2 %v593_v41  ;;  %v2733_v50 = vadd.f32 %v1101_v15, %v989_v32  ;;  %v2735_v44 = vadd.f32 %v1327_v21, %v1215_v60  ;;  %v597_v15 = vld [vmem:[%s3110_s2 + $0x150] sm:$0xff]  ;;  %v598_v21 = vld [vmem:[%s3110_s2 + $0x158] sm:$0xff]  ;;  %v599_v41 = vld [vmem:[%s3110_s2 + $0x160] sm:$0xff]  ;;  %1493 = vperm.xlu1 %2003, %v1485_v46  }
  0xfa   : > { %3143 = vst [vmem:[#allocation22_spill] sm:$0xff] %v2728_v29  ;;  %v605_v46 = vld [vmem:[%s3110_s2 + $0x190] sm:$0xff] }
  0xfb   : > { %3144 = vst [vmem:[#allocation23_spill] sm:$0xff] %v2733_v50  ;;  %1905 = vmatmul.msk.f32.gmra.mxu1 %vm871_vm0, %v594_v40  ;;  %v729_v59 = vpop.permute.xlu0 %728 }
  0xfc   : > { %3145 = vst [vmem:[#allocation24_spill] sm:$0xff] %v2735_v44  ;;  %1937 = vmatmul.msk.f32.gmra.mxu3 %vm871_vm0, %v594_v40  ;;  %v995_v48 = vadd.f32 %v994_v36, %v729_v59  ;;  %v1220_v30 = vpop.f32.mrf.mxu2 }
  0xfd   : > { %v1221_v62 = vadd.f32 %v1220_v30, %v729_v59  ;;  %v2739_v38 = vpop.f32.mrf.mxu0  ;;  %v601_v30 = vld [vmem:[%s3110_s2 + $0x170] sm:$0xff] }
  0xfe   : > { %v2744_v3 = vadd.f32 %v1107_v34, %v995_v48  ;;  %v600_v34 = vld [vmem:[%s3110_s2 + $0x168] sm:$0xff] }
  0xff   : > { %v1333_v2 = vpop.f32.mrf.mxu3 }
 0x100   : > { %3146 = vst [vmem:[#allocation25_spill] sm:$0xff] %v2744_v3  ;;  %v2746_v5 = vadd.f32 %v1333_v2, %v1221_v62  ;;  %v2748_v6 = vpop.f32.mrf.mxu1  ;;  %1044 = vmatmul.f32.gmra.mxu0 %v595_v53 }
 0x101   : > { %3148 = vst [vmem:[#allocation27_spill] sm:$0xff] %v2748_v6  ;;  %1270 = vmatmul.f32.gmra.mxu2 %v595_v53 }
 0x102   : > { %3147 = vst [vmem:[#allocation26_spill] sm:$0xff] %v2746_v5 }
 0x103   : > { %1906 = vmatmul.msk.f32.gmra.mxu1 %vm871_vm0, %v596_v7 }
 0x104   : > { %1938 = vmatmul.msk.f32.gmra.mxu3 %vm871_vm0, %v596_v7  ;;  %v1223_v9 = vpop.f32.mrf.mxu2  ;;  %v602_v7 = vld [vmem:[%s3110_s2 + $0x178] sm:$0xff] }
 0x105   : > { %v1224_v10 = vadd.f32 %v1223_v9, %v2695_v12  ;;  %v2759_v11 = vpop.f32.mrf.mxu0 }
 0x107   : > { %v1336_v16 = vpop.f32.mrf.mxu3 }
 0x108   : > { %v2764_v18 = vadd.f32 %v1336_v16, %v1224_v10  ;;  %v2766_v20 = vpop.f32.mrf.mxu1  ;;  %1047 = vmatmul.f32.gmra.mxu0 %v597_v15 }
 0x109   : > { %1273 = vmatmul.f32.gmra.mxu2 %v597_v15  ;;  %v603_v15 = vld [vmem:[%s3110_s2 + $0x180] sm:$0xff] }
 0x10a   : > { %3149 = vst [vmem:[#allocation28_spill] sm:$0xff] %v2764_v18 }
 0x10b   : > { %1907 = vmatmul.msk.f32.gmra.mxu1 %vm871_vm0, %v598_v21 }
 0x10c   : > { %1939 = vmatmul.msk.f32.gmra.mxu3 %vm871_vm0, %v598_v21  ;;  %v1226_v27 = vpop.f32.mrf.mxu2 }
 0x10d   : > { %v1227_v35 = vadd.f32 %v1226_v27, %v2647_v54  ;;  %v2777_v36 = vpop.f32.mrf.mxu0  ;;  %v604_v27 = vld [vmem:[%s3110_s2 + $0x188] sm:$0xff] }
 0x10f   : > { %v1339_v47 = vpop.f32.mrf.mxu3 }
 0x110   : > { %v2785_v32 = vadd.f32 %v1339_v47, %v1227_v35  ;;  %v2787_v60 = vpop.f32.mrf.mxu1  ;;  %1050 = vmatmul.f32.gmra.mxu0 %v599_v41 }
 0x111   : > { %1276 = vmatmul.f32.gmra.mxu2 %v599_v41 }
 0x112   : > { %3150 = vst [vmem:[#allocation29_spill] sm:$0xff] %v2785_v32 }
 0x113   : > { %1908 = vmatmul.msk.f32.gmra.mxu1 %vm871_vm0, %v600_v34 }
 0x114   : > { %1940 = vmatmul.msk.f32.gmra.mxu3 %vm871_vm0, %v600_v34  ;;  %v1229_v40 = vpop.f32.mrf.mxu2  ;;  %v709_v34 = vld [vmem:[%s3112_s4 + $0xf0] sm:$0xff] }
 0x115   : > { %v1230_v59 = vadd.f32 %v1229_v40, %v2706_v17  ;;  %v2795_v48 = vpop.f32.mrf.mxu0  ;;  %863 = vperm.xlu2 %2004, %v709_v34  }
 0x117   : > { %v1342_v62 = vpop.f32.mrf.mxu3 }
 0x118   : > { %v2800_v53 = vadd.f32 %v1342_v62, %v1230_v59  ;;  %v2802_v2 = vpop.f32.mrf.mxu1  ;;  %1053 = vmatmul.f32.gmra.mxu0 %v601_v30  ;;  %v606_v59 = vld [vmem:[%s3110_s2 + $0x198] sm:$0xff] }
 0x119   : > { %1279 = vmatmul.f32.gmra.mxu2 %v601_v30 }
 0x11a   : > { %3151 = vst [vmem:[#allocation30_spill] sm:$0xff] %v2800_v53 }
 0x11b   : > { %1909 = vmatmul.msk.f32.gmra.mxu1 %vm871_vm0, %v602_v7 }
 0x11c   : > { %1941 = vmatmul.msk.f32.gmra.mxu3 %vm871_vm0, %v602_v7  ;;  %v1232_v8 = vpop.f32.mrf.mxu2  ;;  %v607_v7 = vld [vmem:[%s3110_s2 + $0x1a0] sm:$0xff] }
 0x11d   : > { %v1233_v9 = vadd.f32 %v1232_v8, %v2669_v49  ;;  %v2810_v10 = vpop.f32.mrf.mxu0 }
 0x11f   : > { %v1345_v16 = vpop.f32.mrf.mxu3 }
 0x120   : > { %v2815_v21 = vadd.f32 %v1345_v16, %v1233_v9  ;;  %v2817_v25 = vpop.f32.mrf.mxu1  ;;  %1056 = vmatmul.f32.gmra.mxu0 %v603_v15 }
 0x121   : > { %1282 = vmatmul.f32.gmra.mxu2 %v603_v15  ;;  %v608_v15 = vld [vmem:[%s3110_s2 + $0x1a8] sm:$0xff] }
 0x122   : > { %3152 = vst [vmem:[#allocation31_spill] sm:$0xff] %v2815_v21 }
 0x123   : > { %1910 = vmatmul.msk.f32.gmra.mxu1 %vm871_vm0, %v604_v27 }
 0x124   : > { %1942 = vmatmul.msk.f32.gmra.mxu3 %vm871_vm0, %v604_v27  ;;  %v2824_v35 = vpop.f32.mrf.mxu2 }
 0x125   : > { %v2826_v41 = vpop.f32.mrf.mxu0 }
 0x127   : > { %v2831_v47 = vpop.f32.mrf.mxu3 }
 0x128   : > { %v2836_v40 = vpop.f32.mrf.mxu1  ;;  %1059 = vmatmul.f32.gmra.mxu0 %v605_v46 }
 0x129   : > { %1285 = vmatmul.f32.gmra.mxu2 %v605_v46  ;;  %v609_v46 = vld [vmem:[%s3110_s2 + $0x1b0] sm:$0xff] }
 0x12b   : > { %1911 = vmatmul.msk.f32.gmra.mxu1 %vm871_vm0, %v606_v59 }
 0x12c   : > { %1943 = vmatmul.msk.f32.gmra.mxu3 %vm871_vm0, %v606_v59  ;;  %v2843_v30 = vpop.f32.mrf.mxu2 }
 0x12d   : > { %v2845_v62 = vpop.f32.mrf.mxu0 }
 0x12f   : > { %v2850_v8 = vpop.f32.mrf.mxu3 }
 0x130   : > { %v2852_v9 = vpop.f32.mrf.mxu1  ;;  %1062 = vmatmul.f32.gmra.mxu0 %v607_v7 }
 0x131   : > { %1288 = vmatmul.f32.gmra.mxu2 %v607_v7  ;;  %v610_v7 = vld [vmem:[%s3110_s2 + $0x1b8] sm:$0xff] }
 0x133   : > { %1912 = vmatmul.msk.f32.gmra.mxu1 %vm871_vm0, %v608_v15 }
 0x134   : > { %1944 = vmatmul.msk.f32.gmra.mxu3 %vm871_vm0, %v608_v15  ;;  %v2859_v16 = vpop.f32.mrf.mxu2 }
 0x135   : > { %v1018_v27 = vpop.f32.mrf.mxu0 }
 0x136   : > { %v1019_v3 = vadd.f32 %v1018_v27, %v2588_v37 }
 0x137   : > { %v2864_v34 = vpop.f32.mrf.mxu3 }
 0x138   : > { %v2866_v59 = vpop.f32.mrf.mxu1  ;;  %1065 = vmatmul.f32.gmra.mxu0 %v609_v46 }
 0x139   : > { %1291 = vmatmul.f32.gmra.mxu2 %v609_v46  ;;  %v612_v46 = vld [vmem:[%s3110_s2 + $0x1c8] sm:$0xff] }
 0x13b   : > { %1913 = vmatmul.msk.f32.gmra.mxu1 %vm871_vm0, %v610_v7 }
 0x13c   : > { %1945 = vmatmul.msk.f32.gmra.mxu3 %vm871_vm0, %v610_v7  ;;  %v2873_v15 = vpop.f32.mrf.mxu2 }
 0x13d   : > { %v1021_v0 = vpop.f32.mrf.mxu0 }
 0x13e   : > { %v1022_v32 = vadd.f32 %v1021_v0, %v2643_v43 }
 0x13f   : > { %v2878_v28 = vpop.f32.mrf.mxu3 }
 0x140   : > { %v1134_v57 = vpop.f32.mrf.mxu1  ;;  %1068 = vmatmul.f32.gmra.mxu0 %v611_v51 }
 0x141   : > { %1294 = vmatmul.f32.gmra.mxu2 %v611_v51  ;;  %v614_v51 = vld [vmem:[%s3110_s2 + $0x1d8] sm:$0xff]  ;;  %v1135_v45 = vadd.f32 %v1134_v57, %v1022_v32  ;;  %v1245_v32 = vadd.f32 %v2873_v15, %v2588_v37  ;;  %v1004_v37 = vadd.f32 %v2777_v36, %v2706_v17  ;;  %v1236_v17 = vadd.f32 %v2824_v35, %v2621_v58 }
 0x143   : > { %1914 = vmatmul.msk.f32.gmra.mxu1 %vm871_vm0, %v612_v46 }
 0x144   : > { %1946 = vmatmul.msk.f32.gmra.mxu3 %vm871_vm0, %v612_v46  ;;  %v1247_v7 = vpop.f32.mrf.mxu2 }
 0x145   : > { %v1024_v31 = vpop.f32.mrf.mxu0  ;;  %v1248_v27 = vadd.f32 %v1247_v7, %v2643_v43  ;;  %v1007_v43 = vadd.f32 %v2795_v48, %v2669_v49  ;;  %v1358_v48 = vadd.f32 %v2878_v28, %v1245_v32  ;;  %v3158_v32 = vld [vmem:[#allocation30_spill] sm:$0xff] }
 0x147   : > { %v2888_v52 = vpop.f32.mrf.mxu3  ;;  %v1120_v15 = vadd.f32 %v2802_v2, %v1007_v43 }
 0x148   : > { %v1137_v4 = vpop.f32.mrf.mxu1  ;;  %1071 = vmatmul.f32.gmra.mxu0 %v613_v61 }
 0x149   : > { %1297 = vmatmul.f32.gmra.mxu2 %v613_v61  ;;  %v616_v61 = vld [vmem:[%s3110_s2 + $0x1e8] sm:$0xff] }
 0x14b   : > { %1915 = vmatmul.msk.f32.gmra.mxu1 %vm871_vm0, %v614_v51 }
 0x14c   : > { %1947 = vmatmul.msk.f32.gmra.mxu3 %vm871_vm0, %v614_v51  ;;  %v1250_v46 = vpop.f32.mrf.mxu2 }
 0x14d   : > { %v1027_v39 = vpop.f32.mrf.mxu0  ;;  %v1251_v6 = vadd.f32 %v1250_v46, %v2565_v24 }
 0x14e   : > { %v1028_v51 = vadd.f32 %v1027_v39, %v2593_v42 }
 0x14f   : > { %v1363_v55 = vpop.f32.mrf.mxu3 }
 0x150   : > { %v1140_v44 = vpop.f32.mrf.mxu1  ;;  %1074 = vmatmul.f32.gmra.mxu0 %v615_v14 }
 0x151   : > { %1300 = vmatmul.f32.gmra.mxu2 %v615_v14  ;;  %v1025_v14 = vadd.f32 %v1024_v31, %v2565_v24  ;;  %v1141_v39 = vadd.f32 %v1140_v44, %v1028_v51  ;;  %v1016_v31 = vadd.f32 %v2845_v62, %v2635_v63  ;;  %v1010_v24 = vadd.f32 %v2810_v10, %v2621_v58 }
 0x152   : > { %v1443_v58 = vmax.f32 %v1358_v48, 0.0 }
 0x153   : > { %1916 = vmatmul.msk.f32.gmra.mxu1 %vm871_vm0, %v616_v61  ;;  %v1138_v21 = vadd.f32 %v1137_v4, %v1025_v14  ;;  %v1448_v0 = vmax.f32 %v1141_v39, 0.0  ;;  %v794_v4 = vpop.permute.xlu0 %793  ;;  %v1364_v14 = vadd.f32 %v1363_v55, %v1251_v6  ;;  %v1239_v55 = vadd.f32 %v2843_v30, %v2676_v1 }
 0x154   : > { %1948 = vmatmul.msk.f32.gmra.mxu3 %vm871_vm0, %v616_v61  ;;  %v1253_v29 = vpop.f32.mrf.mxu2  ;;  %v618_v61 = vld [vmem:[%s3110_s2 + $0x1f8] sm:$0xff] }
 0x155   : > { %v1030_v5 = vpop.f32.mrf.mxu0  ;;  %v1254_v23 = vadd.f32 %v1253_v29, %v2593_v42  ;;  %v1013_v42 = vadd.f32 %v2826_v41, %v2676_v1  ;;  %v1132_v29 = vadd.f32 %v2866_v59, %v1019_v3  ;;  %v1446_v62 = vmax.f32 %v1138_v21, 0.0 }
 0x156   : > { %v1031_v18 = vadd.f32 %v1030_v5, %v2612_v56  ;;  %v1444_v41 = vmax.f32 %v1135_v45, 0.0  ;;  %v1361_v21 = vadd.f32 %v2888_v52, %v1248_v27  ;;  %v1123_v45 = vadd.f32 %v2817_v25, %v1010_v24  ;;  %v3157_v24 = vld [vmem:[#allocation25_spill] sm:$0xff] }
 0x157   : > { %v1366_v50 = vpop.f32.mrf.mxu3  ;;  %v1442_v10 = vmax.f32 %v1132_v29, 0.0  ;;  %v1352_v2 = vadd.f32 %v2850_v8, %v1239_v55 }
 0x158   : > { %v1143_v26 = vpop.f32.mrf.mxu1  ;;  %1077 = vmatmul.f32.gmra.mxu0 %v617_v13  ;;  %v1367_v51 = vadd.f32 %v1366_v50, %v1254_v23  ;;  %v1126_v23 = vadd.f32 %v2836_v40, %v1013_v42  ;;  %v1242_v50 = vadd.f32 %v2859_v16, %v2635_v63  ;;  %v1447_v40 = vmax.f32 %v1364_v14, 0.0 }
 0x159   : > { %1303 = vmatmul.f32.gmra.mxu2 %v617_v13  ;;  %v1144_v53 = vadd.f32 %v1143_v26, %v1031_v18  ;;  %v1001_v16 = vadd.f32 %v2759_v11, %v2647_v54  ;;  %v1445_v30 = vmax.f32 %v1361_v21, 0.0  ;;  %v1117_v54 = vadd.f32 %v2787_v60, %v1004_v37  ;;  %v3153_v60 = vld [vmem:[#allocation27_spill] sm:$0xff] }
 0x15a   : > { %v1355_v25 = vadd.f32 %v2864_v34, %v1242_v50  ;;  %v1438_v7 = vmax.f32 %v1126_v23, 0.0  ;;  %v1436_v34 = vmax.f32 %v1123_v45, 0.0  ;;  %v3159_v23 = vld [vmem:[#allocation29_spill] sm:$0xff]  ;;  %v3161_v45 = vld [vmem:[#allocation23_spill] sm:$0xff] }
 0x15b   : > { %v1450_v5 = vmax.f32 %v1144_v53, 0.0  ;;  %1917 = vmatmul.msk.f32.gmra.mxu1 %vm871_vm0, %v618_v61  ;;  %v1114_v39 = vadd.f32 %v2766_v20, %v1001_v16  ;;  %v3154_v20 = vld [vmem:[#allocation15_spill] sm:$0xff]  ;;  %v1431_v50 = vmax.f32 %v3159_v23, 0.0  ;;  %v1422_v55 = vmax.f32 %v3161_v45, 0.0  ;;  %v3164_v16 = vld [vmem:[#allocation26_spill] sm:$0xff] }
 0x15c   : > { %1949 = vmatmul.msk.f32.gmra.mxu3 %vm871_vm0, %v618_v61  ;;  %v1256_v13 = vpop.f32.mrf.mxu2  ;;  %v998_v61 = vadd.f32 %v2739_v38, %v2695_v12  ;;  %v992_v12 = vadd.f32 %v2708_v19, %v2678_v33  ;;  %v3155_v19 = vld [vmem:[#allocation20_spill] sm:$0xff] }
 0x15d   : > { %v1257_v26 = vadd.f32 %v1256_v13, %v2612_v56  ;;  %1502 = vmatpush.msrb.mxu1 %v1450_v5  ;;  %v1033_v44 = vpop.f32.mrf.mxu0  ;;  %v1129_v56 = vadd.f32 %v2852_v9, %v1016_v31  ;;  %v1449_v9 = vmax.f32 %v1367_v51, 0.0  ;;  %v1349_v5 = vadd.f32 %v2831_v47, %v1236_v17  ;;  %v3156_v51 = vld [vmem:[#allocation31_spill] sm:$0xff] }
 0x15e   : > { %v1034_v53 = vadd.f32 %v1033_v44, %v794_v4  ;;  %v1441_v31 = vmax.f32 %v1355_v25, 0.0  ;;  %v1434_v13 = vmax.f32 %v1120_v15, 0.0  ;;  %v1111_v8 = vadd.f32 %v3153_v60, %v998_v61  ;;  %v1480_v17 = vld [vmem:[%s3111_s3] sm:$0xff]  ;;  %v3166_v61 = vld [vmem:[#allocation24_spill] sm:$0xff] }
 0x15f   : > { %v1369_v18 = vpop.f32.mrf.mxu3  ;;  %1503 = vmatpush.msrb.mxu1 %v1448_v0  ;;  %v1440_v6 = vmax.f32 %v1129_v56, 0.0  ;;  %v1432_v44 = vmax.f32 %v1117_v54, 0.0  ;;  %v1105_v27 = vadd.f32 %v3155_v19, %v992_v12  ;;  %v1426_v56 = vmax.f32 %v3157_v24, 0.0  ;;  %v1482_v12 = vld [vmem:[%s3111_s3 + $0x10] sm:$0xff] }
 0x160   : > { %v1370_v57 = vadd.f32 %v1369_v18, %v1257_v26  ;;  %v1146_v46 = vpop.f32.mrf.mxu1  ;;  %v1430_v18 = vmax.f32 %v1114_v39, 0.0  ;;  %v1427_v15 = vmax.f32 %v3164_v16, 0.0  ;;  %v1423_v54 = vmax.f32 %v3166_v61, 0.0  ;;  %v3168_v39 = vld [vmem:[#allocation19_spill] sm:$0xff] }
 0x161   : > { %1504 = vmatpush.msrb.mxu1 %v1446_v62  ;;  %v2930_v59 = vadd.f32 %v1146_v46, %v1034_v53  ;;  %v1437_v53 = vmax.f32 %v1349_v5, 0.0  ;;  %v1433_v46 = vmax.f32 %v3158_v32, 0.0  ;;  %v1424_v43 = vmax.f32 %v1105_v27, 0.0 }
 0x162   : > { %v1451_v3 = vmax.f32 %v1370_v57, 0.0  ;;  %v1435_v57 = vmax.f32 %v3156_v51, 0.0  ;;  %v1421_v5 = vmax.f32 %v3168_v39, 0.0  ;;  %v3173_v39 = vld [vmem:[#allocation7_spill] sm:$0xff] }
 0x163   : > { %1505 = vmatpush.msrb.mxu1 %v1444_v41 }
 0x164   : > { %1548 = vmatpush.msrb.mxu0 %v1451_v3  ;;  %v1259_v49 = vpop.f32.mrf.mxu2 }
 0x165   : > { %v1260_v63 = vadd.f32 %v1259_v49, %v794_v4  ;;  %1506 = vmatpush.msrb.mxu1 %v1442_v10  ;;  %v1036_v52 = vpop.f32.mrf.mxu0  ;;  %v1439_v4 = vmax.f32 %v1352_v2, 0.0  ;;  %v3160_v10 = vld [vmem:[#allocation21_spill] sm:$0xff]  ;;  %v3162_v49 = vld [vmem:[#allocation28_spill] sm:$0xff] }
 0x166   : > { %1549 = vmatpush.msrb.mxu0 %v1449_v9  ;;  %v1037_v36 = vadd.f32 %v1036_v52, %v2713_v22 }
 0x167   : > { %v1372_v1 = vpop.f32.mrf.mxu3  ;;  %1507 = vmatpush.msrb.mxu1 %v1440_v6  ;;  %v1429_v6 = vmax.f32 %v3162_v49, 0.0 }
 0x168   : > { %v2951_v28 = vadd.f32 %v1372_v1, %v1260_v63  ;;  %1550 = vmatpush.msrb.mxu0 %v1447_v40  ;;  %v1149_v11 = vpop.f32.mrf.mxu1  ;;  %v3163_v63 = vld [vmem:[#allocation18_spill] sm:$0xff] }
 0x169   : > { %v2957_v35 = vadd.f32 %v1149_v11, %v1037_v36  ;;  %1508 = vmatpush.msrb.mxu1 %v1438_v7  ;;  %v1420_v52 = vmax.f32 %v3163_v63, 0.0  ;;  %v3165_v36 = vld [vmem:[#allocation22_spill] sm:$0xff]  ;;  %v3167_v11 = vld [vmem:[#allocation16_spill] sm:$0xff] }
 0x16a   : > { %1551 = vmatpush.msrb.mxu0 %v1445_v30  ;;  %v1425_v1 = vmax.f32 %v3165_v36, 0.0 }
 0x16b   : > { %1509 = vmatpush.msrb.mxu1 %v1436_v34 }
 0x16c   : > { %1552 = vmatpush.msrb.mxu0 %v1443_v58  ;;  %v1262_v38 = vpop.f32.mrf.mxu2 }
 0x16d   : > { %v1263_v0 = vadd.f32 %v1262_v38, %v2713_v22  ;;  %1510 = vmatpush.msrb.mxu1 %v1434_v13  ;;  %v1039_v26 = vpop.f32.mrf.mxu0  ;;  %v1428_v22 = vmax.f32 %v1111_v8, 0.0 }
 0x16e   : > { %1553 = vmatpush.msrb.mxu0 %v1441_v31  ;;  %v1040_v42 = vadd.f32 %v1039_v26, %v3154_v20 }
 0x16f   : > { %v1375_v47 = vpop.f32.mrf.mxu3  ;;  %1511 = vmatpush.msrb.mxu1 %v1432_v44 }
 0x170   : > { %v2966_v29 = vadd.f32 %v1375_v47, %v1263_v0  ;;  %1554 = vmatpush.msrb.mxu0 %v1439_v4  ;;  %v1152_v33 = vpop.f32.mrf.mxu1  ;;  %v3169_v0 = vld [vmem:[#allocation12_spill] sm:$0xff] }
 0x171   : > { %v2969_v62 = vadd.f32 %v1152_v33, %v1040_v42  ;;  %1512 = vmatpush.msrb.mxu1 %v1430_v18  ;;  %v3170_v33 = vld [vmem:[#allocation17_spill] sm:$0xff] }
 0x172   : > { %1555 = vmatpush.msrb.mxu0 %v1437_v53 }
 0x173   : > { %1513 = vmatpush.msrb.mxu1 %v1428_v22 }
 0x174   : > { %1556 = vmatpush.msrb.mxu0 %v1435_v57  ;;  %v1265_v41 = vpop.f32.mrf.mxu2 }
 0x175   : > { %v1266_v14 = vadd.f32 %v1265_v41, %v3154_v20  ;;  %1514 = vmatpush.msrb.mxu1 %v1426_v56  ;;  %v1042_v3 = vpop.f32.mrf.mxu0 }
 0x176   : > { %1557 = vmatpush.msrb.mxu0 %v1433_v46  ;;  %v1043_v21 = vadd.f32 %v1042_v3, %v3160_v10 }
 0x177   : > { %v1378_v9 = vpop.f32.mrf.mxu3  ;;  %1515 = vmatpush.msrb.mxu1 %v1424_v43 }
 0x178   : > { %v2977_v37 = vadd.f32 %v1378_v9, %v1266_v14  ;;  %1558 = vmatpush.msrb.mxu0 %v1431_v50  ;;  %v1155_v48 = vpop.f32.mrf.mxu1 }
 0x179   : > { %v2981_v40 = vadd.f32 %v1155_v48, %v1043_v21  ;;  %1516 = vmatpush.msrb.mxu1 %v1422_v55 }
 0x17a   : > { %1559 = vmatpush.msrb.mxu0 %v1429_v6 }
 0x17b   : > { %1517 = vmatpush.msrb.mxu1 %v1420_v52 }
 0x17c   : > { %1560 = vmatpush.msrb.mxu0 %v1427_v15  ;;  %v1268_v25 = vpop.f32.mrf.mxu2  ;;  %1518 = vmatmul.f32.vlgmr.msrb.gmra.mxu1 %v1480_v17 }
 0x17d   : > { %v1269_v30 = vadd.f32 %v1268_v25, %v3160_v10  ;;  %v1045_v7 = vpop.f32.mrf.mxu0 }
 0x17e   : > { %1561 = vmatpush.msrb.mxu0 %v1425_v1  ;;  %v1046_v2 = vadd.f32 %v1045_v7, %v3167_v11  ;;  %v3171_v7 = vld [vmem:[#allocation9_spill] sm:$0xff] }
 0x17f   : > { %v1381_v58 = vpop.f32.mrf.mxu3 }
 0x180   : > { %v2992_v34 = vadd.f32 %v1381_v58, %v1269_v30  ;;  %1562 = vmatpush.msrb.mxu0 %v1423_v54  ;;  %v1158_v31 = vpop.f32.mrf.mxu1 }
 0x181   : > { %v2995_v13 = vadd.f32 %v1158_v31, %v1046_v2 }
 0x182   : > { %1563 = vmatpush.msrb.mxu0 %v1421_v5 }
 0x183   : > { %1564 = vmatmul.f32.vlgmr.msrb.gmra.mxu0 %v1480_v17 }
 0x184   : > { %v1271_v38 = vpop.f32.mrf.mxu2  ;;  %1521 = vmatmul.f32.gmra.mxu1 %v1482_v12 }
 0x185   : > { %v1272_v60 = vadd.f32 %v1271_v38, %v3167_v11  ;;  %v1048_v8 = vpop.f32.mrf.mxu0  ;;  %v3172_v11 = vld [vmem:[#allocation11_spill] sm:$0xff] }
 0x186   : > { %v1049_v26 = vadd.f32 %v1048_v8, %v3169_v0 }
 0x187   : > { %v1384_v44 = vpop.f32.mrf.mxu3 }
 0x188   : > { %v3002_v4 = vadd.f32 %v1384_v44, %v1272_v60  ;;  %v1161_v20 = vpop.f32.mrf.mxu1 }
 0x189   : > { %v3004_v42 = vadd.f32 %v1161_v20, %v1049_v26 }
 0x18b   : > { %1567 = vmatmul.f32.gmra.mxu0 %v1482_v12  ;;  %v3174_v12 = vld [vmem:[#allocation10_spill] sm:$0xff] }
 0x18c   : > { %v1274_v47 = vpop.f32.mrf.mxu2 }
 0x18d   : > { %v1275_v18 = vadd.f32 %v1274_v47, %v3169_v0  ;;  %v1051_v53 = vpop.f32.mrf.mxu0  ;;  %v3175_v0 = vld [vmem:[#allocation14_spill] sm:$0xff] }
 0x18e   : > { %v1052_v19 = vadd.f32 %v1051_v53, %v3170_v33 }
 0x18f   : > { %v1387_v27 = vpop.f32.mrf.mxu3 }
 0x190   : > { %v3008_v22 = vadd.f32 %v1387_v27, %v1275_v18  ;;  %v1164_v51 = vpop.f32.mrf.mxu1  ;;  %v3176_v18 = vld [vmem:[#allocation8_spill] sm:$0xff] }
 0x191   : > { %v3010_v57 = vadd.f32 %v1164_v51, %v1052_v19 }
 0x194   : > { %v1277_v24 = vpop.f32.mrf.mxu2 }
 0x195   : > { %v1278_v56 = vadd.f32 %v1277_v24, %v3170_v33  ;;  %v1054_v32 = vpop.f32.mrf.mxu0 }
 0x197   : > { %v1390_v46 = vpop.f32.mrf.mxu3 }
 0x198   : > { %v3013_v41 = vadd.f32 %v1390_v46, %v1278_v56  ;;  %v1167_v14 = vpop.f32.mrf.mxu1  ;;  %v3177_v56 = vld [vmem:[#allocation13_spill] sm:$0xff] }
 0x199   : > { %v1055_v46 = vadd.f32 %v1054_v32, %v3177_v56 }
 0x19c   : > { %v1280_v3 = vpop.f32.mrf.mxu2 }
 0x19d   : > { %v1057_v43 = vpop.f32.mrf.mxu0 }
 0x19e   : > { %v1058_v53 = vadd.f32 %v1057_v43, %v3176_v18 }
 0x19f   : > { %v3015_v23 = vpop.f32.mrf.mxu3 }
 0x1a0   : > { %v1170_v50 = vpop.f32.mrf.mxu1 }
 0x1a4   : > { %v1283_v10 = vpop.f32.mrf.mxu2 }
 0x1a5   : > { %v1060_v21 = vpop.f32.mrf.mxu0 }
 0x1a6   : > { %v1061_v26 = vadd.f32 %v1060_v21, %v3175_v0 }
 0x1a7   : > { %v3017_v9 = vpop.f32.mrf.mxu3 }
 0x1a8   : > { %v1173_v45 = vpop.f32.mrf.mxu1 }
 0x1ac   : > { %v1286_v55 = vpop.f32.mrf.mxu2 }
 0x1ad   : > { %v1063_v49 = vpop.f32.mrf.mxu0  ;;  %v1287_v43 = vadd.f32 %v1286_v55, %v3175_v0 }
 0x1ae   : > { %v1064_v38 = vadd.f32 %v1063_v49, %v3174_v12  ;;  %v1174_v49 = vadd.f32 %v1173_v45, %v1061_v26 }
 0x1af   : > { %v1399_v6 = vpop.f32.mrf.mxu3 }
 0x1b0   : > { %v1176_v48 = vpop.f32.mrf.mxu1 }
 0x1b1   : > { %v1177_v19 = vadd.f32 %v1176_v48, %v1064_v38  ;;  %v1461_v38 = vmax.f32 %v3002_v4, 0.0  ;;  %v1453_v4 = vmax.f32 %v2951_v28, 0.0 }
 0x1b3   : > { %v1472_v48 = vmax.f32 %v1177_v19, 0.0 }
 0x1b4   : > { %v1289_v63 = vpop.f32.mrf.mxu2 }
 0x1b5   : > { %v1066_v52 = vpop.f32.mrf.mxu0  ;;  %v1290_v21 = vadd.f32 %v1289_v63, %v3174_v12  ;;  %v1281_v63 = vadd.f32 %v1280_v3, %v3177_v56  ;;  %v1462_v3 = vmax.f32 %v3004_v42, 0.0  ;;  %v1465_v12 = vmax.f32 %v3013_v41, 0.0 }
 0x1b6   : > { %v1067_v5 = vadd.f32 %v1066_v52, %v3173_v39  ;;  %v1454_v42 = vmax.f32 %v2957_v35, 0.0  ;;  %v1455_v35 = vmax.f32 %v2966_v29, 0.0 }
 0x1b7   : > { %v1402_v16 = vpop.f32.mrf.mxu3 }
 0x1b8   : > { %v1179_v15 = vpop.f32.mrf.mxu1  ;;  %v1403_v32 = vadd.f32 %v1402_v16, %v1290_v21 }
 0x1b9   : > { %v1180_v44 = vadd.f32 %v1179_v15, %v1067_v5 }
 0x1bb   : > { %v1474_v15 = vmax.f32 %v1180_v44, 0.0 }
 0x1bc   : > { %v1292_v17 = vpop.f32.mrf.mxu2 }
 0x1bd   : > { %v1069_v36 = vpop.f32.mrf.mxu0  ;;  %v1293_v27 = vadd.f32 %v1292_v17, %v3173_v39 }
 0x1be   : > { %v1070_v61 = vadd.f32 %v1069_v36, %v3171_v7 }
 0x1bf   : > { %v1405_v1 = vpop.f32.mrf.mxu3 }
 0x1c0   : > { %v1182_v25 = vpop.f32.mrf.mxu1 }
 0x1c1   : > { %v1183_v60 = vadd.f32 %v1182_v25, %v1070_v61  ;;  %v1168_v61 = vadd.f32 %v1167_v14, %v1055_v46  ;;  %v1464_v14 = vmax.f32 %v3010_v57, 0.0  ;;  %v1456_v57 = vmax.f32 %v2969_v62, 0.0  ;;  %v1481_v62 = vld [vmem:[%s3111_s3 + $0x8] sm:$0xff] }
 0x1c3   : > { %v1476_v51 = vmax.f32 %v1183_v60, 0.0 }
 0x1c4   : > { %v1295_v30 = vpop.f32.mrf.mxu2 }
 0x1c5   : > { %v1072_v54 = vpop.f32.mrf.mxu0  ;;  %v1296_v20 = vadd.f32 %v1295_v30, %v3171_v7  ;;  %v1171_v30 = vadd.f32 %v1170_v50, %v1058_v53  ;;  %v1406_v7 = vadd.f32 %v1405_v1, %v1293_v27  ;;  %v1466_v50 = vmax.f32 %v1168_v61, 0.0  ;;  %v1494_v53 = vpop.permute.xlu1 %1493 }
 0x1c6   : > { %v1073_v2 = vadd.f32 %v1072_v54, %v3172_v11  ;;  %v1284_v54 = vadd.f32 %v1283_v10, %v3176_v18  ;;  %v1473_v1 = vmax.f32 %v1403_v32, 0.0  ;;  %v1394_v10 = vadd.f32 %v3015_v23, %v1281_v63  ;;  %v1489_v18 = vpop.permute.xlu0 %1488 }
 0x1c7   : > { %v1408_v58 = vpop.f32.mrf.mxu3  ;;  %v1475_v39 = vmax.f32 %v1406_v7, 0.0  ;;  %v1463_v23 = vmax.f32 %v3008_v22, 0.0  ;;  %v1457_v22 = vmax.f32 %v2977_v37, 0.0 }
 0x1c8   : > { %v1185_v31 = vpop.f32.mrf.mxu1  ;;  %v1409_v36 = vadd.f32 %v1408_v58, %v1296_v20  ;;  %v1400_v58 = vadd.f32 %v1399_v6, %v1287_v43  ;;  %v1397_v55 = vadd.f32 %v3017_v9, %v1284_v54  ;;  %v1460_v6 = vmax.f32 %v2995_v13, 0.0 }
 0x1c9   : > { %v1186_v8 = vadd.f32 %v1185_v31, %v1073_v2  ;;  %v1468_v2 = vmax.f32 %v1171_v30, 0.0  ;;  %v1467_v31 = vmax.f32 %v1394_v10, 0.0  ;;  %v1458_v9 = vmax.f32 %v2981_v40, 0.0 }
 0x1ca   : > { %v1477_v45 = vmax.f32 %v1409_v36, 0.0  ;;  %v1471_v16 = vmax.f32 %v1400_v58, 0.0  ;;  %v1469_v5 = vmax.f32 %v1397_v55, 0.0  ;;  %v1459_v13 = vmax.f32 %v2992_v34, 0.0 }
 0x1cb   : > { %v1478_v47 = vmax.f32 %v1186_v8, 0.0  ;;  %v1452_v40 = vmax.f32 %v2930_v59, 0.0  ;;  %v1483_v59 = vld [vmem:[%s3111_s3 + $0x18] sm:$0xff] }
 0x1cc   : > { %v1298_v33 = vpop.f32.mrf.mxu2 }
 0x1cd   : > { %v1299_v24 = vadd.f32 %v1298_v33, %v3172_v11  ;;  %1527 = vmatpush.msrb.mxu3 %v1478_v47  ;;  %v1470_v11 = vmax.f32 %v1174_v49, 0.0  ;;  %v1075_v34 = vpop.f32.mrf.mxu0 }
 0x1ce   : > { %v869_v10 = vpop.permute.xlu0 %868 }
 0x1cf   : > { %v1411_v52 = vpop.f32.mrf.mxu3  ;;  %1528 = vmatpush.msrb.mxu3 %v1476_v51 }
 0x1d0   : > { %v1412_v25 = vadd.f32 %v1411_v52, %v1299_v24  ;;  %v1188_v37 = vpop.f32.mrf.mxu1 }
 0x1d1   : > { %1529 = vmatpush.msrb.mxu3 %v1474_v15 }
 0x1d2   : > { %v1479_v17 = vmax.f32 %v1412_v25, 0.0 }
 0x1d3   : > { %1530 = vmatpush.msrb.mxu3 %v1472_v48 }
 0x1d4   : > { %1573 = vmatpush.msrb.mxu2 %v1479_v17  ;;  %v1301_v60 = vpop.f32.mrf.mxu2 }
 0x1d5   : > { %1531 = vmatpush.msrb.mxu3 %v1470_v11  ;;  %v1078_v8 = vpop.f32.mrf.mxu0 }
 0x1d6   : > { %1574 = vmatpush.msrb.mxu2 %v1477_v45 }
 0x1d7   : > { %1532 = vmatpush.msrb.mxu3 %v1468_v2  ;;  %v3059_v41 = vpop.f32.mrf.mxu3 }
 0x1d8   : > { %1575 = vmatpush.msrb.mxu2 %v1475_v39  ;;  %v1191_v29 = vpop.f32.mrf.mxu1 }
 0x1d9   : > { %1533 = vmatpush.msrb.mxu3 %v1466_v50 }
 0x1da   : > { %1576 = vmatpush.msrb.mxu2 %v1473_v1  ;;  %v864_v1 = vpop.permute.xlu2 %863 }
 0x1db   : > { %1534 = vmatpush.msrb.mxu3 %v1464_v14 }
 0x1dc   : > { %1577 = vmatpush.msrb.mxu2 %v1471_v16  ;;  %v1304_v26 = vpop.f32.mrf.mxu2  ;;  %v1076_v16 = vadd.f32 %v1075_v34, %v864_v1 }
 0x1dd   : > { %1535 = vmatpush.msrb.mxu3 %v1462_v3  ;;  %v1079_v3 = vadd.f32 %v1078_v8, %v869_v10 }
 0x1de   : > { %1578 = vmatpush.msrb.mxu2 %v1469_v5 }
 0x1df   : > { %1536 = vmatpush.msrb.mxu3 %v1460_v6  ;;  %v3061_v28 = vpop.f32.mrf.mxu3 }
 0x1e0   : > { %1579 = vmatpush.msrb.mxu2 %v1467_v31 }
 0x1e1   : > { %1537 = vmatpush.msrb.mxu3 %v1458_v9 }
 0x1e2   : > { %1580 = vmatpush.msrb.mxu2 %v1465_v12  ;;  %v1189_v12 = vadd.f32 %v1188_v37, %v1076_v16 }
 0x1e3   : > { %1538 = vmatpush.msrb.mxu3 %v1456_v57 }
 0x1e4   : > { %1581 = vmatpush.msrb.mxu2 %v1463_v23  ;;  %v1192_v23 = vadd.f32 %v1191_v29, %v1079_v3 }
 0x1e5   : > { %1539 = vmatpush.msrb.mxu3 %v1454_v42 }
 0x1e6   : > { %1582 = vmatpush.msrb.mxu2 %v1461_v38  ;;  %v1302_v38 = vadd.f32 %v1301_v60, %v864_v1 }
 0x1e7   : > { %1540 = vmatpush.msrb.mxu3 %v1452_v40  ;;  %v1305_v40 = vadd.f32 %v1304_v26, %v869_v10  ;;  %v1683_v10 = vlaneseq }
 0x1e8   : > { %1583 = vmatpush.msrb.mxu2 %v1459_v13  ;;  %1950 = vmatmul.msk.f32.vlgmr.msrb.gmra.mxu3 %vm871_vm0, %v1481_v62 }
 0x1e9   : > { %v1418_v8 = vadd.f32 %v3061_v28, %v1305_v40  ;;  %vm1685_vm5 = vcmp.lt.s32.totalorder %v1683_v10, 256 }
 0x1ea   : > { %1584 = vmatpush.msrb.mxu2 %v1457_v22 }
 0x1ec   : > { %1585 = vmatpush.msrb.mxu2 %v1455_v35 }
 0x1ee   : > { %1586 = vmatpush.msrb.mxu2 %v1453_v4  ;;  %v1415_v4 = vadd.f32 %v3059_v41, %v1302_v38 }
 0x1ef   : > { %1952 = vmatmul.msk.f32.vlgmr.msrb.gmra.mxu2 %vm871_vm0, %v1481_v62 }
 0x1f0   : > { %1951 = vmatmul.msk.f32.gmra.mxu3 %vm871_vm0, %v1483_v59 }
 0x1f7   : > { %1953 = vmatmul.msk.f32.gmra.mxu2 %vm871_vm0, %v1483_v59 }
 0x1f9   : > { %v1519_v0 = vpop.f32.mrf.mxu1 }
 0x1fa   : > { %v1520_v19 = vadd.f32 %v1519_v0, %v1489_v18 }
 0x200   : > { %v1565_v44 = vpop.f32.mrf.mxu0 }
 0x201   : > { %v1522_v47 = vpop.f32.mrf.mxu1  ;;  %v1566_v52 = vadd.f32 %v1565_v44, %v1489_v18 }
 0x202   : > { %v1523_v27 = vadd.f32 %v1522_v47, %v1494_v53 }
 0x208   : > { %v1568_v46 = vpop.f32.mrf.mxu0 }
 0x209   : > { %v1569_v21 = vadd.f32 %v1568_v46, %v1494_v53 }
 0x26b   : > { %v1542_v20 = vpop.f32.mrf.mxu3 }
 0x26c   : > { %v1543_v24 = vadd.f32 %v1542_v20, %v1520_v19 }
 0x272   : > { %v1588_v33 = vpop.f32.mrf.mxu2 }
 0x273   : > { %v1545_v51 = vpop.f32.mrf.mxu3  ;;  %v1589_v25 = vadd.f32 %v1588_v33, %v1566_v52 }
 0x274   : > { %v1546_v56 = vadd.f32 %v1545_v51, %v1523_v27 }
 0x276   : > { %v1594_v49 = vmax.f32 %v1543_v24, %v1546_v56 }
 0x278   : > { %v1595_v15 = vrot.slane %v1594_v49, 4 }
 0x27a   : > { %v1591_v36 = vpop.f32.mrf.mxu2  ;;  %v1596_v30 = vmax.f32 %v1594_v49, %v1595_v15 }
 0x27b   : > { %v1592_v43 = vadd.f32 %v1591_v36, %v1569_v21 }
 0x27c   : > { %v1597_v48 = vrot.slane %v1596_v30, 2 }
 0x27d   : > { %v1601_v7 = vmax.f32 %v1589_v25, %v1592_v43 }
 0x27e   : > { %v1598_v17 = vmax.f32 %v1596_v30, %v1597_v48 }
 0x27f   : > { %v1602_v61 = vrot.slane %v1601_v7, 4 }
 0x280   : > { %v1599_v54 = vrot.slane %v1598_v17, 1 }
 0x281   : > { %v1603_v11 = vmax.f32 %v1601_v7, %v1602_v61 }
 0x282   : > { %v1600_v32 = vmax.f32 %v1598_v17, %v1599_v54 }
 0x283   : > { %v1604_v45 = vrot.slane %v1603_v11, 2 }
 0x284   : > { %v1608_v63 = vsub.f32 %v1543_v24, %v1600_v32  ;;  %v1610_v2 = vsub.f32 %v1546_v56, %v1600_v32 }
 0x285   : > { %v1605_v58 = vmax.f32 %v1603_v11, %v1604_v45  ;;  %v1656_v11 = vld [vmem:[%s307_s22] sm:$0x3] }
 0x286   : > { %v1612_v39 = vmul.f32 1.442695, %v1608_v63  ;;  %v1616_v50 = vmul.f32 1.442695, %v1610_v2 }
 0x287   : > { %v1606_v55 = vrot.slane %v1605_v58, 1 }
 0x288   : > { %2005 = vpow2.f32 %v1612_v39 }
 0x289   : > { %v1607_v14 = vmax.f32 %v1605_v58, %v1606_v55  ;;  %2007 = vpow2.f32 %v1616_v50 }
 0x28b   : > { %v1609_v5 = vsub.f32 %v1589_v25, %v1607_v14  ;;  %v1611_v6 = vsub.f32 %v1592_v43, %v1607_v14 }
 0x28d   : > { %v1614_v31 = vmul.f32 1.442695, %v1609_v5  ;;  %v1618_v9 = vmul.f32 1.442695, %v1611_v6 }
 0x28e   : > { %v2006_v57 = vpop.eup %2005 }
 0x28f   : > { %2009 = vpow2.f32 %v1614_v31  ;;  %v2008_v42 = vpop.eup %2007  ;;  %v1634_v13 = vmul.f32 %v2006_v57, %v1189_v12 }
 0x290   : > { %2011 = vpow2.f32 %v1618_v9  ;;  %v1620_v62 = vadd.f32 %v2008_v42, %v2006_v57  ;;  %v1636_v22 = vmul.f32 %v2008_v42, %v1192_v23 }
 0x292   : > { %v1621_v35 = vrot.slane %v1620_v62, 4  ;;  %v1638_v59 = vadd.f32 %v1636_v22, %v1634_v13 }
 0x294   : > { %v1622_v0 = vadd.f32 %v1621_v35, %v1620_v62  ;;  %v1639_v60 = vrot.slane %v1638_v59, 4 }
 0x295   : > { %v2010_v34 = vpop.eup %2009 }
 0x296   : > { %v2012_v44 = vpop.eup %2011  ;;  %v1635_v37 = vmul.f32 %v2010_v34, %v1415_v4  ;;  %v1623_v20 = vrot.slane %v1622_v0, 2  ;;  %v1640_v51 = vadd.f32 %v1639_v60, %v1638_v59 }
 0x297   : > { %v1627_v29 = vadd.f32 %v2012_v44, %v2010_v34  ;;  %v1637_v47 = vmul.f32 %v2012_v44, %v1418_v8 }
 0x298   : > { %v1624_v18 = vadd.f32 %v1623_v20, %v1622_v0  ;;  %v1641_v49 = vrot.slane %v1640_v51, 2 }
 0x299   : > { %v1628_v53 = vrot.slane %v1627_v29, 4  ;;  %v1645_v26 = vadd.f32 %v1637_v47, %v1635_v37 }
 0x29a   : > { %v1625_v27 = vrot.slane %v1624_v18, 1  ;;  %v1642_v36 = vadd.f32 %v1641_v49, %v1640_v51 }
 0x29b   : > { %v1629_v33 = vadd.f32 %v1628_v53, %v1627_v29  ;;  %v1646_v19 = vrot.slane %v1645_v26, 4 }
 0x29c   : > { %v1626_v28 = vadd.f32 %v1625_v27, %v1624_v18  ;;  %v1643_v30 = vrot.slane %v1642_v36, 1 }
 0x29d   : > { %v1630_v41 = vrot.slane %v1629_v33, 2  ;;  %v1647_v24 = vadd.f32 %v1646_v19, %v1645_v26 }
 0x29e   : > { %2013 = vrcp.f32 %v1626_v28  ;;  %v1644_v17 = vadd.f32 %v1643_v30, %v1642_v36 }
 0x29f   : > { %v1631_v56 = vadd.f32 %v1630_v41, %v1629_v33  ;;  %v1648_v46 = vrot.slane %v1647_v24, 2 }
 0x2a1   : > { %v1632_v52 = vrot.slane %v1631_v56, 1  ;;  %v1649_v21 = vadd.f32 %v1648_v46, %v1647_v24 }
 0x2a3   : > { %v1633_v15 = vadd.f32 %v1632_v52, %v1631_v56  ;;  %v1650_v25 = vrot.slane %v1649_v21, 1 }
 0x2a4   : > { %v2014_v43 = vpop.eup %2013 }
 0x2a5   : > { %2015 = vrcp.f32 %v1633_v15  ;;  %v1651_v48 = vadd.f32 %v1650_v25, %v1649_v21  ;;  %v1654_v54 = vmul.f32 %v2014_v43, %v1644_v17 }
 0x2ab   : > { %v2016_v7 = vpop.eup %2015 }
 0x2ac   : > { %v1655_v61 = vmul.f32 %v2016_v7, %v1651_v48 }
 0x2ae   : > { %v1659_v32 = vrot.slane %v1655_v61, 7 }
 0x2b0   : > { %v1661_v45 = vsel %vm1660_vm1, %v1654_v54, %v1659_v32 }
 0x2b1   : > { %v1663_v63 = vadd.f32 %v1661_v45, %v1656_v11 }
 0x2b3   : > { %v1954_v2 = vmul.f32 -1.442695, %v1663_v63 }
 0x2b5   : > { %2017 = vpow2.f32 %v1954_v2 }
 0x2bb   : > { %v2018_v58 = vpop.eup %2017 }
 0x2bc   : > { %v1667_v39 = vadd.f32 1.0, %v2018_v58 }
 0x2be   : > { %2019 = vrcp.f32 %v1667_v39  ;;  %v1679_v14 = vand.u32 2147483648, %v1667_v39  ;;  %v1677_v3 = vand.u32 2147483647, %v1667_v39  ;;  %vm1673_vm3 = vweird.f32 %v1667_v39 }
 0x2c0   : > { %v1680_v6 = vor.u32 1.1754944e-38, %v1679_v14  ;;  %vm1678_vm6 = vcmp.eq.f32.partialorder %v1677_v3, 8.507059e+37 }
 0x2c4   : > { %v2020_v50 = vpop.eup %2019 }
 0x2c5   : > { %v1669_v55 = vmul.f32 %v2020_v50, %v1667_v39  ;;  %vm1674_vm2 = vweird.f32 %v2020_v50 }
 0x2c6   : > { %vm1675_vm4 = vmor %vm1673_vm3, %vm1674_vm2 }
 0x2c7   : > { %v1670_v1 = vsub.f32 1.0, %v1669_v55 }
 0x2c9   : > { %v1671_v16 = vmul.f32 %v2020_v50, %v1670_v1 }
 0x2cb   : > { %v1672_v5 = vadd.f32 %v2020_v50, %v1671_v16 }
 0x2cd   : > { %v1676_v31 = vsel %vm1675_vm4, %v2020_v50, %v1672_v5 }
 0x2ce   : > { %v1681_v9 = vsel %vm1678_vm6, %v1680_v6, %v1676_v31 }
 0x2cf   : > { %1687 = vst.msk [vmem:[%s302_s17] sm:$0x3] %vm1685_vm5, %v1681_v9 }
 0x2d0   : > { %2048 = shalt.err (!%p2045_p7)
}
 0x2d1   : > { %1962 = dma.vmem_to_hbm [thread:$0]  (%p2154_p6), %s1702_s23, 32, %s1704_s25, %s1689_s26  }
 0x2d2 PF: > { %s1715_s16 = sand.u32 1, %s2071_s18   ;;  %p1965_p10 = pnand %p1780_p9, %p2158_p8 }
 0x2d3   : > { %s1716_s22 = scalar_lea.sflag [#allocation5], %s1715_s16 }
 0x2d4   : > { %p1966_p11 = pneg %p1965_p10 }
 0x2d6   : > { %2066 = dma.done.wait (%p1966_p11), %s1716_s22, 32  }
 0x2d7   : > { %2068 = vsyncadd (%p1966_p11), %s1716_s22, 4294967264  ;;  %p15_p12 = scmp.ge.s32.totalorder %s2139_s24, 4   ;;  %s3178_s18 = smov %s2075_s19 }
 0x2d8   : > { %s3179_s19 = smov %s2079_s20  ;;  %s3180_s20 = smov %s2152_s27 }
 0x2d9   : > { %s3181_s21 = smov %s2139_s24  ;;  %17 = sbr.rel (!%p15_p12) target bundleno = 3 (0x3), region = 111 }
 0x2de   :  { %1722 = vsyncpa [#allocation5], 1 }
 0x2df   :  { %1724 = vsyncpa [#allocation5 + $0x1], 1 }

</bundles_post_ra>
